<compile_context>
chip_gen: v7x
topology: tpu7x:2x2x1
jax: 0.10.0
libtpu: 0.0.40
codegen_flags: <defaults>
</compile_context>

<pallas_src>
import functools

import jax
import jax.numpy as jnp
from jax.experimental import pallas as pl
from jax.experimental.pallas import tpu as pltpu

EPS = 1e-5
VMEM_LIMIT = 32 * 1024 * 1024  # conservative scoped-VMEM budget (safe on v5e/v6e/v7x)


def _round_up(x, m):
    return ((x + m - 1) // m) * m


def _tiling(batch):
    """Pick (tile, ncores, tiles_per_core, padded_batch) for the batch-row grid.

    Tiles are multiples of 16 (bf16 sublane packing) unless a single tile covers the
    whole (8-padded) batch.  Batches that don't divide evenly are zero-padded and the
    padded rows are masked out of the BN statistics."""
    if batch <= 256:
        tile = max(8, _round_up(batch, 8))
        return tile, 1, 1, tile
    half = _round_up(pl.cdiv(batch, 2), 16)
    if half <= 1024:                       # two tiles, one per TensorCore on v7x
        return half, 2, 1, 2 * half
    best = None
    for tile in (1024, 512, 256):          # larger tiles amortize per-step overhead
        nt = _round_up(pl.cdiv(batch, tile), 2)
        padded = nt * tile
        if best is None or padded < best[3]:
            best = (tile, 2, nt // 2, padded)
    return best


def _bn_scale_shift(sum_parts, ssq_parts, gamma, beta, inv_batch):
    """Fused BN affine (y = h*scale + shift) from per-core one-pass partial stats.

    NOTE: one-pass variance (E[x^2]-E[x]^2) in f32 can lose precision for features
    with |mean| >> std; acceptable here (clamped at 0, eps added)."""
    s = jnp.sum(sum_parts, axis=0)     # (1, H): combine per-core partials
    ss = jnp.sum(ssq_parts, axis=0)    # (1, H)
    mean = s * inv_batch
    var = jnp.maximum(ss * inv_batch - mean * mean, 0.0)
    scale = gamma * jax.lax.rsqrt(var + EPS)
    shift = beta - mean * scale
    return scale, shift


def _row_mask(tile, npc, batch):
    """(tile, 1) bool mask of rows that belong to the real (un-padded) batch."""
    c = pl.program_id(0)
    i = pl.program_id(1)
    row0 = (c * npc + i) * tile
    rows = row0 + jax.lax.broadcasted_iota(jnp.int32, (tile, 1), 0)
    return rows < batch


def _compiler_params():
    return pltpu.CompilerParams(dimension_semantics=("parallel", "arbitrary"),
                                vmem_limit_bytes=VMEM_LIMIT)


# ---- kernel 1: stats-only Linear (h1 is not materialized) -----------------------

def stats_kernel(x_ref, w_ref, b_ref, sum_ref, ssq_ref, *, tile, npc, batch, need_mask):
    i = pl.program_id(1)

    @pl.when(i == 0)
    def _():
        sum_ref[...] = jnp.zeros_like(sum_ref)
        ssq_ref[...] = jnp.zeros_like(ssq_ref)

    h = jnp.dot(x_ref[...], w_ref[...], preferred_element_type=jnp.float32) + b_ref[...]
    if need_mask:
        h = jnp.where(_row_mask(tile, npc, batch), h, 0.0)
    sum_ref[...] += jnp.sum(h, axis=0).reshape(sum_ref.shape)
    ssq_ref[...] += jnp.sum(h * h, axis=0).reshape(ssq_ref.shape)


# ---- kernel 2: recompute h1 + BN1+ReLU + Linear2 + stats of h2 -------------------

def layer12_kernel(x_ref, w1_ref, b1_ref, s1_ref, q1_ref, g1_ref, be1_ref,
                   w2_ref, b2_ref,
                   h2_ref, s2_ref, q2_ref,
                   scale_sc, shift_sc,
                   *, inv_batch, tile, npc, batch, need_mask):
    i = pl.program_id(1)

    @pl.when(i == 0)
    def _():
        scale, shift = _bn_scale_shift(s1_ref[...], q1_ref[...],
                                       g1_ref[...], be1_ref[...], inv_batch)
        scale_sc[...] = scale
        shift_sc[...] = shift
        s2_ref[...] = jnp.zeros_like(s2_ref)
        q2_ref[...] = jnp.zeros_like(q2_ref)

    h1 = jnp.dot(x_ref[...], w1_ref[...], preferred_element_type=jnp.float32) + b1_ref[...]
    a1 = jnp.maximum(h1 * scale_sc[...] + shift_sc[...], 0.0).astype(jnp.bfloat16)
    h2 = jnp.dot(a1, w2_ref[...], preferred_element_type=jnp.float32) + b2_ref[...]
    h2_ref[...] = h2.astype(h2_ref.dtype)          # bf16 store (halves HBM traffic)
    if need_mask:
        h2 = jnp.where(_row_mask(tile, npc, batch), h2, 0.0)
    s2_ref[...] += jnp.sum(h2, axis=0).reshape(s2_ref.shape)
    q2_ref[...] += jnp.sum(h2 * h2, axis=0).reshape(q2_ref.shape)


# ---- kernel 3: BN+ReLU + Linear + stats (middle layer) ---------------------------

def bn_relu_linear_stats_kernel(h_ref, s_ref, q_ref, g_ref, be_ref, w_ref, b_ref,
                                o_ref, so_ref, qo_ref,
                                scale_sc, shift_sc,
                                *, inv_batch, tile, npc, batch, need_mask):
    i = pl.program_id(1)

    @pl.when(i == 0)
    def _():
        scale, shift = _bn_scale_shift(s_ref[...], q_ref[...],
                                       g_ref[...], be_ref[...], inv_batch)
        scale_sc[...] = scale
        shift_sc[...] = shift
        so_ref[...] = jnp.zeros_like(so_ref)
        qo_ref[...] = jnp.zeros_like(qo_ref)

    h = h_ref[...].astype(jnp.float32)
    a = jnp.maximum(h * scale_sc[...] + shift_sc[...], 0.0).astype(jnp.bfloat16)
    o = jnp.dot(a, w_ref[...], preferred_element_type=jnp.float32) + b_ref[...]
    o_ref[...] = o.astype(o_ref.dtype)             # bf16 store
    if need_mask:
        o = jnp.where(_row_mask(tile, npc, batch), o, 0.0)
    so_ref[...] += jnp.sum(o, axis=0).reshape(so_ref.shape)
    qo_ref[...] += jnp.sum(o * o, axis=0).reshape(qo_ref.shape)


# ---- kernel 4: BN+ReLU + (B,128)x(128,1) head as VPU mul + lane reduction --------

def bn_relu_head_kernel(h_ref, s_ref, q_ref, g_ref, be_ref, w4_ref, b4_ref,
                        out_ref, scale_sc, shift_sc, *, inv_batch):
    i = pl.program_id(1)

    @pl.when(i == 0)
    def _():
        scale, shift = _bn_scale_shift(s_ref[...], q_ref[...],
                                       g_ref[...], be_ref[...], inv_batch)
        scale_sc[...] = scale
        shift_sc[...] = shift

    a = jnp.maximum(h_ref[...].astype(jnp.float32) * scale_sc[...] + shift_sc[...], 0.0)
    v = jnp.sum(a * w4_ref[...], axis=-1, keepdims=True) + b4_ref[...]
    out_ref[...] = v.astype(out_ref.dtype)


# ---- pallas_call wrappers --------------------------------------------------------

def _stats_call(x, w, b, tile, ncores, npc, batch):
    padded_batch, d_in = x.shape
    h_dim = w.shape[1]
    row = lambda c, i: (c * npc + i, 0)
    rep = lambda c, i: (0, 0)
    core = lambda c, i: (c, 0, 0)
    kernel = functools.partial(stats_kernel, tile=tile, npc=npc, batch=batch,
                               need_mask=(padded_batch != batch))
    return pl.pallas_call(
        kernel,
        grid=(ncores, npc),
        in_specs=[
            pl.BlockSpec((tile, d_in), row),
            pl.BlockSpec((d_in, h_dim), rep),
            pl.BlockSpec((1, h_dim), rep),
        ],
        out_specs=[
            pl.BlockSpec((1, 1, h_dim), core),
            pl.BlockSpec((1, 1, h_dim), core),
        ],
        out_shape=[
            jax.ShapeDtypeStruct((ncores, 1, h_dim), jnp.float32),
            jax.ShapeDtypeStruct((ncores, 1, h_dim), jnp.float32),
        ],
        compiler_params=_compiler_params(),
    )(x, w, b)


def _layer12_call(x, w1, b1, s1, q1, g1, be1, w2, b2, tile, ncores, npc, batch):
    padded_batch, d_in = x.shape
    h1_dim = w1.shape[1]
    h2_dim = w2.shape[1]
    row = lambda c, i: (c * npc + i, 0)
    rep = lambda c, i: (0, 0)
    rep3 = lambda c, i: (0, 0, 0)
    core = lambda c, i: (c, 0, 0)
    kernel = functools.partial(layer12_kernel, inv_batch=1.0 / batch, tile=tile,
                               npc=npc, batch=batch,
                               need_mask=(padded_batch != batch))
    return pl.pallas_call(
        kernel,
        grid=(ncores, npc),
        in_specs=[
            pl.BlockSpec((tile, d_in), row),           # x (bf16)
            pl.BlockSpec((d_in, h1_dim), rep),         # W1 (bf16)
            pl.BlockSpec((1, h1_dim), rep),            # b1
            pl.BlockSpec((ncores, 1, h1_dim), rep3),   # sum1
            pl.BlockSpec((ncores, 1, h1_dim), rep3),   # ssq1
            pl.BlockSpec((1, h1_dim), rep),            # gamma1
            pl.BlockSpec((1, h1_dim), rep),            # beta1
            pl.BlockSpec((h1_dim, h2_dim), rep),       # W2 (bf16)
            pl.BlockSpec((1, h2_dim), rep),            # b2
        ],
        out_specs=[
            pl.BlockSpec((tile, h2_dim), row),
            pl.BlockSpec((1, 1, h2_dim), core),
            pl.BlockSpec((1, 1, h2_dim), core),
        ],
        out_shape=[
            jax.ShapeDtypeStruct((padded_batch, h2_dim), jnp.bfloat16),
            jax.ShapeDtypeStruct((ncores, 1, h2_dim), jnp.float32),
            jax.ShapeDtypeStruct((ncores, 1, h2_dim), jnp.float32),
        ],
        scratch_shapes=[
            pltpu.VMEM((1, h1_dim), jnp.float32),      # hoisted BN scale
            pltpu.VMEM((1, h1_dim), jnp.float32),      # hoisted BN shift
        ],
        compiler_params=_compiler_params(),
    )(x, w1, b1, s1, q1, g1, be1, w2, b2)


def _mid_layer_call(h, s, q, g, be, w, b, tile, ncores, npc, batch):
    padded_batch, d_in = h.shape
    h_dim = w.shape[1]
    row = lambda c, i: (c * npc + i, 0)
    rep = lambda c, i: (0, 0)
    rep3 = lambda c, i: (0, 0, 0)
    core = lambda c, i: (c, 0, 0)
    kernel = functools.partial(bn_relu_linear_stats_kernel, inv_batch=1.0 / batch,
                               tile=tile, npc=npc, batch=batch,
                               need_mask=(padded_batch != batch))
    return pl.pallas_call(
        kernel,
        grid=(ncores, npc),
        in_specs=[
            pl.BlockSpec((tile, d_in), row),           # h (bf16)
            pl.BlockSpec((ncores, 1, d_in), rep3),     # sum
            pl.BlockSpec((ncores, 1, d_in), rep3),     # ssq
            pl.BlockSpec((1, d_in), rep),              # gamma
            pl.BlockSpec((1, d_in), rep),              # beta
            pl.BlockSpec((d_in, h_dim), rep),          # W (bf16)
            pl.BlockSpec((1, h_dim), rep),             # b
        ],
        out_specs=[
            pl.BlockSpec((tile, h_dim), row),
            pl.BlockSpec((1, 1, h_dim), core),
            pl.BlockSpec((1, 1, h_dim), core),
        ],
        out_shape=[
            jax.ShapeDtypeStruct((padded_batch, h_dim), jnp.bfloat16),
            jax.ShapeDtypeStruct((ncores, 1, h_dim), jnp.float32),
            jax.ShapeDtypeStruct((ncores, 1, h_dim), jnp.float32),
        ],
        scratch_shapes=[
            pltpu.VMEM((1, d_in), jnp.float32),
            pltpu.VMEM((1, d_in), jnp.float32),
        ],
        compiler_params=_compiler_params(),
    )(h, s, q, g, be, w, b)


def _head_call(h, s, q, g, be, w4_row, b4, tile, ncores, npc, batch):
    padded_batch, d_in = h.shape
    row = lambda c, i: (c * npc + i, 0)
    rep = lambda c, i: (0, 0)
    rep3 = lambda c, i: (0, 0, 0)
    kernel = functools.partial(bn_relu_head_kernel, inv_batch=1.0 / batch)
    return pl.pallas_call(
        kernel,
        grid=(ncores, npc),
        in_specs=[
            pl.BlockSpec((tile, d_in), row),           # h3 (bf16)
            pl.BlockSpec((ncores, 1, d_in), rep3),
            pl.BlockSpec((ncores, 1, d_in), rep3),
            pl.BlockSpec((1, d_in), rep),
            pl.BlockSpec((1, d_in), rep),
            pl.BlockSpec((1, d_in), rep),              # w4 row (zero-padded)
            pl.BlockSpec((1, 1), rep),                 # b4
        ],
        out_specs=pl.BlockSpec((tile, 1), row),
        out_shape=jax.ShapeDtypeStruct((padded_batch, 1), jnp.float32),
        scratch_shapes=[
            pltpu.VMEM((1, d_in), jnp.float32),
            pltpu.VMEM((1, d_in), jnp.float32),
        ],
        compiler_params=_compiler_params(),
    )(h, s, q, g, be, w4_row, b4)


@jax.jit
def critic_forward(x, params):
    """x: (B, D_in) f32.  Returns value (B, 1) f32 (training-mode BatchNorm)."""
    (w1, b1, g1, be1,
     w2, b2, g2, be2,
     w3, b3, g3, be3,
     w4, b4) = params
    batch = x.shape[0]
    tile, ncores, npc, padded_batch = _tiling(batch)

    # bf16 matmul operands (f32 accumulation via preferred_element_type).
    xb = x.astype(jnp.bfloat16)
    if padded_batch != batch:
        xb = jnp.pad(xb, ((0, padded_batch - batch), (0, 0)))
    w1b = w1.astype(jnp.bfloat16)
    w2b = w2.astype(jnp.bfloat16)

    # Pad layer 3 output 64 -> 128 features (gamma3 / w4 padded with zeros -> inert)
    # for lane-dense h3 stores and full MXU column utilization on v6e/v7x.
    pad3 = _round_up(w3.shape[1], 128) - w3.shape[1]
    w3b = jnp.pad(w3, ((0, 0), (0, pad3))).astype(jnp.bfloat16)
    b3p = jnp.pad(b3, ((0, 0), (0, pad3)))
    g3p = jnp.pad(g3, ((0, 0), (0, pad3)))
    be3p = jnp.pad(be3, ((0, 0), (0, pad3)))
    w4_row = jnp.pad(jnp.reshape(w4, (1, -1)), ((0, 0), (0, pad3)))

    s1, q1 = _stats_call(xb, w1b, b1, tile, ncores, npc, batch)
    h2, s2, q2 = _layer12_call(xb, w1b, b1, s1, q1, g1, be1, w2b, b2,
                               tile, ncores, npc, batch)
    h3, s3, q3 = _mid_layer_call(h2, s2, q2, g2, be2, w3b, b3p,
                                 tile, ncores, npc, batch)
    v = _head_call(h3, s3, q3, g3p, be3p, w4_row, b4, tile, ncores, npc, batch)
    return v[:batch] if padded_batch != batch else v


def init_params(key, input_dim):
    """Deterministic parameter init matching the PyTorch module's shapes.

    Linear weights are stored transposed relative to torch ((in, out)) so the kernels
    compute x @ W.  BatchNorm gamma=1, beta=0 (PyTorch defaults)."""
    dims = [(input_dim, 512), (512, 256), (256, 64), (64, 1)]
    params = []
    for i, (din, dout) in enumerate(dims):
        kw, kb, key = jax.random.split(key, 3)
        bound = 1.0 / jnp.sqrt(jnp.float32(din))
        w = jax.random.uniform(kw, (din, dout), jnp.float32, -bound, bound)
        b = jax.random.uniform(kb, (1, dout), jnp.float32, -bound, bound)
        params.append(w)
        params.append(b)
        if i < 3:  # the first three linears are followed by BatchNorm1d
            params.append(jnp.ones((1, dout), jnp.float32))   # gamma
            params.append(jnp.zeros((1, dout), jnp.float32))  # beta
    return params


def reference_forward(x, params):
    """Pure-JAX f32 reference mirroring the PyTorch forward (training-mode BN)."""
    (w1, b1, g1, be1,
     w2, b2, g2, be2,
     w3, b3, g3, be3,
     w4, b4) = params

    def bn_relu(h, g, be):
        m = jnp.mean(h, axis=0, keepdims=True)
        v = jnp.mean((h - m) ** 2, axis=0, keepdims=True)
        return jnp.maximum((h - m) / jnp.sqrt(v + EPS) * g + be, 0.0)

    h = bn_relu(x @ w1 + b1, g1, be1)
    h = bn_relu(h @ w2 + b2, g2, be2)
    h = bn_relu(h @ w3 + b3, g3, be3)
    return h @ w4 + b4


if __name__ == "__main__":
    key = jax.random.PRNGKey(0)
    kx, kp = jax.random.split(key)

    B, input_dim = 64, 32
    x = jax.random.normal(kx, (B, input_dim), jnp.float32)
    params = init_params(kp, input_dim)

    out = critic_forward(x, params)
    out = jax.block_until_ready(out)

    ref = reference_forward(x, params)
    assert out.shape == (B, 1), out.shape
    # bf16 matmul operands + bf16 h2/h3 storage -> compare at bf16-appropriate tolerance.
    err = jnp.max(jnp.abs(out - ref))
    assert jnp.allclose(out, ref, atol=5e-2, rtol=5e-2), float(err)

    # TODO(synk): Adam optimizer state and checkpoint save/load are host-side and not
    # part of the forward pass; they are intentionally not implemented in Pallas.
    print("KERNEL_OK")
</pallas_src>

<mosaic_0001>
module attributes {stable_mosaic.version = 11 : i64} {
  func.func @stats_kernel(%arg0: i32, %arg1: i32, %arg2: memref<64x32xbf16, #tpu.memory_space<vmem>>, %arg3: memref<32x512xbf16, #tpu.memory_space<vmem>>, %arg4: memref<1x512xf32, #tpu.memory_space<vmem>>, %arg5: memref<1x1x512xf32, #tpu.memory_space<vmem>>, %arg6: memref<1x1x512xf32, #tpu.memory_space<vmem>>) attributes {dimension_semantics = [#tpu.dimension_semantics<parallel>, #tpu.dimension_semantics<arbitrary>], iteration_bounds = array<i64: 1, 1>, scalar_prefetch = 0 : i64, scratch_operands = 0 : i64, tpu.core_type = #tpu.core_type<tc>, window_params = [{transform_indices = @transform_0, window_bounds = array<i64: 64, 32>}, {pipeline_mode = #tpu.pipeline_mode<synchronous>, transform_indices = @transform_1, window_bounds = array<i64: 32, 512>}, {pipeline_mode = #tpu.pipeline_mode<synchronous>, transform_indices = @transform_2, window_bounds = array<i64: 1, 512>}, {transform_indices = @transform_3, window_bounds = array<i64: 1, 1, 512>}, {transform_indices = @transform_4, window_bounds = array<i64: 1, 1, 512>}]} {
    %c0_i32 = arith.constant 0 : i32
    %0 = arith.cmpi eq, %arg1, %c0_i32 : i32
    %1 = arith.extui %0 : i1 to i32
    %c0_i32_0 = arith.constant 0 : i32
    %2 = arith.cmpi ne, %1, %c0_i32_0 : i32
    scf.if %2 {
      %cst_20 = arith.constant 0.000000e+00 : f32
      %20 = vector.broadcast %cst_20 : f32 to vector<1x1x512xf32>
      %c0_21 = arith.constant 0 : index
      %c0_22 = arith.constant 0 : index
      %c0_23 = arith.constant 0 : index
      %21 = vector.load %arg5[%c0_21, %c0_22, %c0_23] : memref<1x1x512xf32, #tpu.memory_space<vmem>>, vector<1x1x512xf32>
      tpu.vector_store %arg5[%c0_21, %c0_22, %c0_23], %20 {strides = array<i32>} : memref<1x1x512xf32, #tpu.memory_space<vmem>>, vector<1x1x512xf32>,
      %cst_24 = arith.constant 0.000000e+00 : f32
      %22 = vector.broadcast %cst_24 : f32 to vector<1x1x512xf32>
      %c0_25 = arith.constant 0 : index
      %c0_26 = arith.constant 0 : index
      %c0_27 = arith.constant 0 : index
      %23 = vector.load %arg6[%c0_25, %c0_26, %c0_27] : memref<1x1x512xf32, #tpu.memory_space<vmem>>, vector<1x1x512xf32>
      tpu.vector_store %arg6[%c0_25, %c0_26, %c0_27], %22 {strides = array<i32>} : memref<1x1x512xf32, #tpu.memory_space<vmem>>, vector<1x1x512xf32>,
    } else {
    }
    %c0 = arith.constant 0 : index
    %c0_1 = arith.constant 0 : index
    %3 = vector.load %arg2[%c0, %c0_1] : memref<64x32xbf16, #tpu.memory_space<vmem>>, vector<64x32xbf16>
    %c0_2 = arith.constant 0 : index
    %c0_3 = arith.constant 0 : index
    %4 = vector.load %arg3[%c0_2, %c0_3] : memref<32x512xbf16, #tpu.memory_space<vmem>>, vector<32x512xbf16>
    %cst = arith.constant dense<0.000000e+00> : vector<64x512xf32>
    %5 = tpu.matmul %3, %4, %cst {dimension_numbers = #tpu.dot_dimension_numbers<[1], [0], [0], [1], [0, 0, 1, 1], [], []>} : vector<64x32xbf16>, vector<32x512xbf16>, vector<64x512xf32> -> vector<64x512xf32>
    %c0_4 = arith.constant 0 : index
    %c0_5 = arith.constant 0 : index
    %6 = vector.load %arg4[%c0_4, %c0_5] : memref<1x512xf32, #tpu.memory_space<vmem>>, vector<1x512xf32>
    %7 = vector.broadcast %6 : vector<1x512xf32> to vector<64x512xf32>
    %8 = arith.addf %5, %7 : vector<64x512xf32>
    %c0_6 = arith.constant 0 : index
    %c0_7 = arith.constant 0 : index
    %c0_8 = arith.constant 0 : index
    %9 = vector.load %arg5[%c0_6, %c0_7, %c0_8] : memref<1x1x512xf32, #tpu.memory_space<vmem>>, vector<1x1x512xf32>
    %cst_9 = arith.constant dense<0.000000e+00> : vector<512xf32>
    %10 = vector.multi_reduction <add>, %8, %cst_9 [0] : vector<64x512xf32> to vector<512xf32>
    %11 = vector.shape_cast %10 : vector<512xf32> to vector<1x1x512xf32>
    %12 = arith.addf %9, %11 : vector<1x1x512xf32>
    %c0_10 = arith.constant 0 : index
    %c0_11 = arith.constant 0 : index
    %c0_12 = arith.constant 0 : index
    %13 = vector.load %arg5[%c0_10, %c0_11, %c0_12] : memref<1x1x512xf32, #tpu.memory_space<vmem>>, vector<1x1x512xf32>
    tpu.vector_store %arg5[%c0_10, %c0_11, %c0_12], %12 {strides = array<i32>} : memref<1x1x512xf32, #tpu.memory_space<vmem>>, vector<1x1x512xf32>,
    %c0_13 = arith.constant 0 : index
    %c0_14 = arith.constant 0 : index
    %c0_15 = arith.constant 0 : index
    %14 = vector.load %arg6[%c0_13, %c0_14, %c0_15] : memref<1x1x512xf32, #tpu.memory_space<vmem>>, vector<1x1x512xf32>
    %15 = arith.mulf %8, %8 : vector<64x512xf32>
    %cst_16 = arith.constant dense<0.000000e+00> : vector<512xf32>
    %16 = vector.multi_reduction <add>, %15, %cst_16 [0] : vector<64x512xf32> to vector<512xf32>
    %17 = vector.shape_cast %16 : vector<512xf32> to vector<1x1x512xf32>
    %18 = arith.addf %14, %17 : vector<1x1x512xf32>
    %c0_17 = arith.constant 0 : index
    %c0_18 = arith.constant 0 : index
    %c0_19 = arith.constant 0 : index
    %19 = vector.load %arg6[%c0_17, %c0_18, %c0_19] : memref<1x1x512xf32, #tpu.memory_space<vmem>>, vector<1x1x512xf32>
    tpu.vector_store %arg6[%c0_17, %c0_18, %c0_19], %18 {strides = array<i32>} : memref<1x1x512xf32, #tpu.memory_space<vmem>>, vector<1x1x512xf32>,
    return
  }
  func.func @transform_0(%arg0: i32, %arg1: i32) -> (i32, i32) {
    %c1_i32 = arith.constant 1 : i32
    %0 = arith.muli %arg0, %c1_i32 : i32
    %1 = arith.addi %0, %arg1 : i32
    %c0_i32 = arith.constant 0 : i32
    %c0_i32_0 = arith.constant 0 : i32
    return %1, %c0_i32 : i32, i32
  }
  func.func @transform_1(%arg0: i32, %arg1: i32) -> (i32, i32) {
    %c0_i32 = arith.constant 0 : i32
    %c0_i32_0 = arith.constant 0 : i32
    %c0_i32_1 = arith.constant 0 : i32
    return %c0_i32, %c0_i32_0 : i32, i32
  }
  func.func @transform_2(%arg0: i32, %arg1: i32) -> (i32, i32) {
    %c0_i32 = arith.constant 0 : i32
    %c0_i32_0 = arith.constant 0 : i32
    %c0_i32_1 = arith.constant 0 : i32
    return %c0_i32, %c0_i32_0 : i32, i32
  }
  func.func @transform_3(%arg0: i32, %arg1: i32) -> (i32, i32, i32) {
    %c0_i32 = arith.constant 0 : i32
    %c0_i32_0 = arith.constant 0 : i32
    %c0_i32_1 = arith.constant 0 : i32
    return %arg0, %c0_i32, %c0_i32_0 : i32, i32, i32
  }
  func.func @transform_4(%arg0: i32, %arg1: i32) -> (i32, i32, i32) {
    %c0_i32 = arith.constant 0 : i32
    %c0_i32_0 = arith.constant 0 : i32
    %c0_i32_1 = arith.constant 0 : i32
    return %arg0, %c0_i32, %c0_i32_0 : i32, i32, i32
  }
}

module attributes {stable_mosaic.version = 11 : i64} {
  func.func @layer12_kernel(%arg0: i32, %arg1: i32, %arg2: memref<64x32xbf16, #tpu.memory_space<vmem>>, %arg3: memref<32x512xbf16, #tpu.memory_space<vmem>>, %arg4: memref<1x512xf32, #tpu.memory_space<vmem>>, %arg5: memref<1x1x512xf32, #tpu.memory_space<vmem>>, %arg6: memref<1x1x512xf32, #tpu.memory_space<vmem>>, %arg7: memref<1x512xf32, #tpu.memory_space<vmem>>, %arg8: memref<1x512xf32, #tpu.memory_space<vmem>>, %arg9: memref<512x256xbf16, #tpu.memory_space<vmem>>, %arg10: memref<1x256xf32, #tpu.memory_space<vmem>>, %arg11: memref<64x256xbf16, #tpu.memory_space<vmem>>, %arg12: memref<1x1x256xf32, #tpu.memory_space<vmem>>, %arg13: memref<1x1x256xf32, #tpu.memory_space<vmem>>, %arg14: memref<1x512xf32, #tpu.memory_space<vmem>>, %arg15: memref<1x512xf32, #tpu.memory_space<vmem>>) attributes {dimension_semantics = [#tpu.dimension_semantics<parallel>, #tpu.dimension_semantics<arbitrary>], iteration_bounds = array<i64: 1, 1>, scalar_prefetch = 0 : i64, scratch_operands = 2 : i64, tpu.core_type = #tpu.core_type<tc>, window_params = [{transform_indices = @transform_0, window_bounds = array<i64: 64, 32>}, {pipeline_mode = #tpu.pipeline_mode<synchronous>, transform_indices = @transform_1, window_bounds = array<i64: 32, 512>}, {pipeline_mode = #tpu.pipeline_mode<synchronous>, transform_indices = @transform_2, window_bounds = array<i64: 1, 512>}, {pipeline_mode = #tpu.pipeline_mode<synchronous>, transform_indices = @transform_3, window_bounds = array<i64: 1, 1, 512>}, {pipeline_mode = #tpu.pipeline_mode<synchronous>, transform_indices = @transform_4, window_bounds = array<i64: 1, 1, 512>}, {pipeline_mode = #tpu.pipeline_mode<synchronous>, transform_indices = @transform_5, window_bounds = array<i64: 1, 512>}, {pipeline_mode = #tpu.pipeline_mode<synchronous>, transform_indices = @transform_6, window_bounds = array<i64: 1, 512>}, {pipeline_mode = #tpu.pipeline_mode<synchronous>, transform_indices = @transform_7, window_bounds = array<i64: 512, 256>}, {pipeline_mode = #tpu.pipeline_mode<synchronous>, transform_indices = @transform_8, window_bounds = array<i64: 1, 256>}, {transform_indices = @transform_9, window_bounds = array<i64: 64, 256>}, {transform_indices = @transform_10, window_bounds = array<i64: 1, 1, 256>}, {transform_indices = @transform_11, window_bounds = array<i64: 1, 1, 256>}]} {
    %c0_i32 = arith.constant 0 : i32
    %0 = arith.cmpi eq, %arg1, %c0_i32 : i32
    %1 = arith.extui %0 : i1 to i32
    %c0_i32_0 = arith.constant 0 : i32
    %2 = arith.cmpi ne, %1, %c0_i32_0 : i32
    scf.if %2 {
      %c0_32 = arith.constant 0 : index
      %c0_33 = arith.constant 0 : index
      %c0_34 = arith.constant 0 : index
      %36 = vector.load %arg5[%c0_32, %c0_33, %c0_34] : memref<1x1x512xf32, #tpu.memory_space<vmem>>, vector<1x1x512xf32>
      %c0_35 = arith.constant 0 : index
      %c0_36 = arith.constant 0 : index
      %c0_37 = arith.constant 0 : index
      %37 = vector.load %arg6[%c0_35, %c0_36, %c0_37] : memref<1x1x512xf32, #tpu.memory_space<vmem>>, vector<1x1x512xf32>
      %c0_38 = arith.constant 0 : index
      %c0_39 = arith.constant 0 : index
      %38 = vector.load %arg7[%c0_38, %c0_39] : memref<1x512xf32, #tpu.memory_space<vmem>>, vector<1x512xf32>
      %c0_40 = arith.constant 0 : index
      %c0_41 = arith.constant 0 : index
      %39 = vector.load %arg8[%c0_40, %c0_41] : memref<1x512xf32, #tpu.memory_space<vmem>>, vector<1x512xf32>
      %cst_42 = arith.constant dense<0.000000e+00> : vector<1x512xf32>
      %40 = vector.multi_reduction <add>, %36, %cst_42 [0] : vector<1x1x512xf32> to vector<1x512xf32>
      %cst_43 = arith.constant dense<0.000000e+00> : vector<1x512xf32>
      %41 = vector.multi_reduction <add>, %37, %cst_43 [0] : vector<1x1x512xf32> to vector<1x512xf32>
      %cst_44 = arith.constant 1.562500e-02 : f32
      %42 = vector.broadcast %cst_44 : f32 to vector<1x512xf32>
      %43 = arith.mulf %40, %42 : vector<1x512xf32>
      %cst_45 = arith.constant 1.562500e-02 : f32
      %44 = vector.broadcast %cst_45 : f32 to vector<1x512xf32>
      %45 = arith.mulf %41, %44 : vector<1x512xf32>
      %46 = arith.mulf %43, %43 : vector<1x512xf32>
      %47 = arith.subf %45, %46 : vector<1x512xf32>
      %cst_46 = arith.constant 0.000000e+00 : f32
      %48 = vector.broadcast %cst_46 : f32 to vector<1x512xf32>
      %49 = arith.maximumf %47, %48 : vector<1x512xf32>
      %cst_47 = arith.constant 9.99999974E-6 : f32
      %50 = vector.broadcast %cst_47 : f32 to vector<1x512xf32>
      %51 = arith.addf %49, %50 : vector<1x512xf32>
      %52 = math.rsqrt %51 : vector<1x512xf32>
      %53 = arith.mulf %38, %52 : vector<1x512xf32>
      %54 = arith.mulf %43, %53 : vector<1x512xf32>
      %55 = arith.subf %39, %54 : vector<1x512xf32>
      %c0_48 = arith.constant 0 : index
      %c0_49 = arith.constant 0 : index
      %56 = vector.load %arg14[%c0_48, %c0_49] : memref<1x512xf32, #tpu.memory_space<vmem>>, vector<1x512xf32>
      tpu.vector_store %arg14[%c0_48, %c0_49], %53 {strides = array<i32>} : memref<1x512xf32, #tpu.memory_space<vmem>>, vector<1x512xf32>,
      %c0_50 = arith.constant 0 : index
      %c0_51 = arith.constant 0 : index
      %57 = vector.load %arg15[%c0_50, %c0_51] : memref<1x512xf32, #tpu.memory_space<vmem>>, vector<1x512xf32>
      tpu.vector_store %arg15[%c0_50, %c0_51], %55 {strides = array<i32>} : memref<1x512xf32, #tpu.memory_space<vmem>>, vector<1x512xf32>,
      %cst_52 = arith.constant 0.000000e+00 : f32
      %58 = vector.broadcast %cst_52 : f32 to vector<1x1x256xf32>
      %c0_53 = arith.constant 0 : index
      %c0_54 = arith.constant 0 : index
      %c0_55 = arith.constant 0 : index
      %59 = vector.load %arg12[%c0_53, %c0_54, %c0_55] : memref<1x1x256xf32, #tpu.memory_space<vmem>>, vector<1x1x256xf32>
      tpu.vector_store %arg12[%c0_53, %c0_54, %c0_55], %58 {strides = array<i32>} : memref<1x1x256xf32, #tpu.memory_space<vmem>>, vector<1x1x256xf32>,
      %cst_56 = arith.constant 0.000000e+00 : f32
      %60 = vector.broadcast %cst_56 : f32 to vector<1x1x256xf32>
      %c0_57 = arith.constant 0 : index
      %c0_58 = arith.constant 0 : index
      %c0_59 = arith.constant 0 : index
      %61 = vector.load %arg13[%c0_57, %c0_58, %c0_59] : memref<1x1x256xf32, #tpu.memory_space<vmem>>, vector<1x1x256xf32>
      tpu.vector_store %arg13[%c0_57, %c0_58, %c0_59], %60 {strides = array<i32>} : memref<1x1x256xf32, #tpu.memory_space<vmem>>, vector<1x1x256xf32>,
    } else {
    }
    %c0 = arith.constant 0 : index
    %c0_1 = arith.constant 0 : index
    %3 = vector.load %arg2[%c0, %c0_1] : memref<64x32xbf16, #tpu.memory_space<vmem>>, vector<64x32xbf16>
    %c0_2 = arith.constant 0 : index
    %c0_3 = arith.constant 0 : index
    %4 = vector.load %arg3[%c0_2, %c0_3] : memref<32x512xbf16, #tpu.memory_space<vmem>>, vector<32x512xbf16>
    %cst = arith.constant dense<0.000000e+00> : vector<64x512xf32>
    %5 = tpu.matmul %3, %4, %cst {dimension_numbers = #tpu.dot_dimension_numbers<[1], [0], [0], [1], [0, 0, 1, 1], [], []>} : vector<64x32xbf16>, vector<32x512xbf16>, vector<64x512xf32> -> vector<64x512xf32>
    %c0_4 = arith.constant 0 : index
    %c0_5 = arith.constant 0 : index
    %6 = vector.load %arg4[%c0_4, %c0_5] : memref<1x512xf32, #tpu.memory_space<vmem>>, vector<1x512xf32>
    %7 = vector.broadcast %6 : vector<1x512xf32> to vector<64x512xf32>
    %8 = arith.addf %5, %7 : vector<64x512xf32>
    %c0_6 = arith.constant 0 : index
    %c0_7 = arith.constant 0 : index
    %9 = vector.load %arg14[%c0_6, %c0_7] : memref<1x512xf32, #tpu.memory_space<vmem>>, vector<1x512xf32>
    %10 = vector.broadcast %9 : vector<1x512xf32> to vector<64x512xf32>
    %11 = arith.mulf %8, %10 : vector<64x512xf32>
    %c0_8 = arith.constant 0 : index
    %c0_9 = arith.constant 0 : index
    %12 = vector.load %arg15[%c0_8, %c0_9] : memref<1x512xf32, #tpu.memory_space<vmem>>, vector<1x512xf32>
    %13 = vector.broadcast %12 : vector<1x512xf32> to vector<64x512xf32>
    %14 = arith.addf %11, %13 : vector<64x512xf32>
    %cst_10 = arith.constant 0.000000e+00 : f32
    %15 = vector.broadcast %cst_10 : f32 to vector<64x512xf32>
    %16 = arith.maximumf %14, %15 : vector<64x512xf32>
    %17 = arith.truncf %16 : vector<64x512xf32> to vector<64x512xbf16>
    %c0_11 = arith.constant 0 : index
    %c0_12 = arith.constant 0 : index
    %18 = vector.load %arg9[%c0_11, %c0_12] : memref<512x256xbf16, #tpu.memory_space<vmem>>, vector<512x256xbf16>
    %cst_13 = arith.constant dense<0.000000e+00> : vector<64x256xf32>
    %19 = tpu.matmul %17, %18, %cst_13 {dimension_numbers = #tpu.dot_dimension_numbers<[1], [0], [0], [1], [0, 0, 1, 1], [], []>} : vector<64x512xbf16>, vector<512x256xbf16>, vector<64x256xf32> -> vector<64x256xf32>
    %c0_14 = arith.constant 0 : index
    %c0_15 = arith.constant 0 : index
    %20 = vector.load %arg10[%c0_14, %c0_15] : memref<1x256xf32, #tpu.memory_space<vmem>>, vector<1x256xf32>
    %21 = vector.broadcast %20 : vector<1x256xf32> to vector<64x256xf32>
    %22 = arith.addf %19, %21 : vector<64x256xf32>
    %23 = arith.truncf %22 : vector<64x256xf32> to vector<64x256xbf16>
    %c0_16 = arith.constant 0 : index
    %c0_17 = arith.constant 0 : index
    %24 = vector.load %arg11[%c0_16, %c0_17] : memref<64x256xbf16, #tpu.memory_space<vmem>>, vector<64x256xbf16>
    tpu.vector_store %arg11[%c0_16, %c0_17], %23 {strides = array<i32>} : memref<64x256xbf16, #tpu.memory_space<vmem>>, vector<64x256xbf16>,
    %c0_18 = arith.constant 0 : index
    %c0_19 = arith.constant 0 : index
    %c0_20 = arith.constant 0 : index
    %25 = vector.load %arg12[%c0_18, %c0_19, %c0_20] : memref<1x1x256xf32, #tpu.memory_space<vmem>>, vector<1x1x256xf32>
    %cst_21 = arith.constant dense<0.000000e+00> : vector<256xf32>
    %26 = vector.multi_reduction <add>, %22, %cst_21 [0] : vector<64x256xf32> to vector<256xf32>
    %27 = vector.shape_cast %26 : vector<256xf32> to vector<1x1x256xf32>
    %28 = arith.addf %25, %27 : vector<1x1x256xf32>
    %c0_22 = arith.constant 0 : index
    %c0_23 = arith.constant 0 : index
    %c0_24 = arith.constant 0 : index
    %29 = vector.load %arg12[%c0_22, %c0_23, %c0_24] : memref<1x1x256xf32, #tpu.memory_space<vmem>>, vector<1x1x256xf32>
    tpu.vector_store %arg12[%c0_22, %c0_23, %c0_24], %28 {strides = array<i32>} : memref<1x1x256xf32, #tpu.memory_space<vmem>>, vector<1x1x256xf32>,
    %c0_25 = arith.constant 0 : index
    %c0_26 = arith.constant 0 : index
    %c0_27 = arith.constant 0 : index
    %30 = vector.load %arg13[%c0_25, %c0_26, %c0_27] : memref<1x1x256xf32, #tpu.memory_space<vmem>>, vector<1x1x256xf32>
    %31 = arith.mulf %22, %22 : vector<64x256xf32>
    %cst_28 = arith.constant dense<0.000000e+00> : vector<256xf32>
    %32 = vector.multi_reduction <add>, %31, %cst_28 [0] : vector<64x256xf32> to vector<256xf32>
    %33 = vector.shape_cast %32 : vector<256xf32> to vector<1x1x256xf32>
    %34 = arith.addf %30, %33 : vector<1x1x256xf32>
    %c0_29 = arith.constant 0 : index
    %c0_30 = arith.constant 0 : index
    %c0_31 = arith.constant 0 : index
    %35 = vector.load %arg13[%c0_29, %c0_30, %c0_31] : memref<1x1x256xf32, #tpu.memory_space<vmem>>, vector<1x1x256xf32>
    tpu.vector_store %arg13[%c0_29, %c0_30, %c0_31], %34 {strides = array<i32>} : memref<1x1x256xf32, #tpu.memory_space<vmem>>, vector<1x1x256xf32>,
    return
  }
  func.func @transform_0(%arg0: i32, %arg1: i32) -> (i32, i32) {
    %c1_i32 = arith.constant 1 : i32
    %0 = arith.muli %arg0, %c1_i32 : i32
    %1 = arith.addi %0, %arg1 : i32
    %c0_i32 = arith.constant 0 : i32
    %c0_i32_0 = arith.constant 0 : i32
    return %1, %c0_i32 : i32, i32
  }
  func.func @transform_1(%arg0: i32, %arg1: i32) -> (i32, i32) {
    %c0_i32 = arith.constant 0 : i32
    %c0_i32_0 = arith.constant 0 : i32
    %c0_i32_1 = arith.constant 0 : i32
    return %c0_i32, %c0_i32_0 : i32, i32
  }
  func.func @transform_2(%arg0: i32, %arg1: i32) -> (i32, i32) {
    %c0_i32 = arith.constant 0 : i32
    %c0_i32_0 = arith.constant 0 : i32
    %c0_i32_1 = arith.constant 0 : i32
    return %c0_i32, %c0_i32_0 : i32, i32
  }
  func.func @transform_3(%arg0: i32, %arg1: i32) -> (i32, i32, i32) {
    %c0_i32 = arith.constant 0 : i32
    %c0_i32_0 = arith.constant 0 : i32
    %c0_i32_1 = arith.constant 0 : i32
    %c0_i32_2 = arith.constant 0 : i32
    return %c0_i32, %c0_i32_0, %c0_i32_1 : i32, i32, i32
  }
  func.func @transform_4(%arg0: i32, %arg1: i32) -> (i32, i32, i32) {
    %c0_i32 = arith.constant 0 : i32
    %c0_i32_0 = arith.constant 0 : i32
    %c0_i32_1 = arith.constant 0 : i32
    %c0_i32_2 = arith.constant 0 : i32
    return %c0_i32, %c0_i32_0, %c0_i32_1 : i32, i32, i32
  }
  func.func @transform_5(%arg0: i32, %arg1: i32) -> (i32, i32) {
    %c0_i32 = arith.constant 0 : i32
    %c0_i32_0 = arith.constant 0 : i32
    %c0_i32_1 = arith.constant 0 : i32
    return %c0_i32, %c0_i32_0 : i32, i32
  }
  func.func @transform_6(%arg0: i32, %arg1: i32) -> (i32, i32) {
    %c0_i32 = arith.constant 0 : i32
    %c0_i32_0 = arith.constant 0 : i32
    %c0_i32_1 = arith.constant 0 : i32
    return %c0_i32, %c0_i32_0 : i32, i32
  }
  func.func @transform_7(%arg0: i32, %arg1: i32) -> (i32, i32) {
    %c0_i32 = arith.constant 0 : i32
    %c0_i32_0 = arith.constant 0 : i32
    %c0_i32_1 = arith.constant 0 : i32
    return %c0_i32, %c0_i32_0 : i32, i32
  }
  func.func @transform_8(%arg0: i32, %arg1: i32) -> (i32, i32) {
    %c0_i32 = arith.constant 0 : i32
    %c0_i32_0 = arith.constant 0 : i32
    %c0_i32_1 = arith.constant 0 : i32
    return %c0_i32, %c0_i32_0 : i32, i32
  }
  func.func @transform_9(%arg0: i32, %arg1: i32) -> (i32, i32) {
    %c1_i32 = arith.constant 1 : i32
    %0 = arith.muli %arg0, %c1_i32 : i32
    %1 = arith.addi %0, %arg1 : i32
    %c0_i32 = arith.constant 0 : i32
    %c0_i32_0 = arith.constant 0 : i32
    return %1, %c0_i32 : i32, i32
  }
  func.func @transform_10(%arg0: i32, %arg1: i32) -> (i32, i32, i32) {
    %c0_i32 = arith.constant 0 : i32
    %c0_i32_0 = arith.constant 0 : i32
    %c0_i32_1 = arith.constant 0 : i32
    return %arg0, %c0_i32, %c0_i32_0 : i32, i32, i32
  }
  func.func @transform_11(%arg0: i32, %arg1: i32) -> (i32, i32, i32) {
    %c0_i32 = arith.constant 0 : i32
    %c0_i32_0 = arith.constant 0 : i32
    %c0_i32_1 = arith.constant 0 : i32
    return %arg0, %c0_i32, %c0_i32_0 : i32, i32, i32
  }
}

module attributes {stable_mosaic.version = 11 : i64} {
  func.func @bn_relu_linear_stats_kernel(%arg0: i32, %arg1: i32, %arg2: memref<64x256xbf16, #tpu.memory_space<vmem>>, %arg3: memref<1x1x256xf32, #tpu.memory_space<vmem>>, %arg4: memref<1x1x256xf32, #tpu.memory_space<vmem>>, %arg5: memref<1x256xf32, #tpu.memory_space<vmem>>, %arg6: memref<1x256xf32, #tpu.memory_space<vmem>>, %arg7: memref<256x128xbf16, #tpu.memory_space<vmem>>, %arg8: memref<1x128xf32, #tpu.memory_space<vmem>>, %arg9: memref<64x128xbf16, #tpu.memory_space<vmem>>, %arg10: memref<1x1x128xf32, #tpu.memory_space<vmem>>, %arg11: memref<1x1x128xf32, #tpu.memory_space<vmem>>, %arg12: memref<1x256xf32, #tpu.memory_space<vmem>>, %arg13: memref<1x256xf32, #tpu.memory_space<vmem>>) attributes {dimension_semantics = [#tpu.dimension_semantics<parallel>, #tpu.dimension_semantics<arbitrary>], iteration_bounds = array<i64: 1, 1>, scalar_prefetch = 0 : i64, scratch_operands = 2 : i64, tpu.core_type = #tpu.core_type<tc>, window_params = [{transform_indices = @transform_0, window_bounds = array<i64: 64, 256>}, {pipeline_mode = #tpu.pipeline_mode<synchronous>, transform_indices = @transform_1, window_bounds = array<i64: 1, 1, 256>}, {pipeline_mode = #tpu.pipeline_mode<synchronous>, transform_indices = @transform_2, window_bounds = array<i64: 1, 1, 256>}, {pipeline_mode = #tpu.pipeline_mode<synchronous>, transform_indices = @transform_3, window_bounds = array<i64: 1, 256>}, {pipeline_mode = #tpu.pipeline_mode<synchronous>, transform_indices = @transform_4, window_bounds = array<i64: 1, 256>}, {pipeline_mode = #tpu.pipeline_mode<synchronous>, transform_indices = @transform_5, window_bounds = array<i64: 256, 128>}, {pipeline_mode = #tpu.pipeline_mode<synchronous>, transform_indices = @transform_6, window_bounds = array<i64: 1, 128>}, {transform_indices = @transform_7, window_bounds = array<i64: 64, 128>}, {transform_indices = @transform_8, window_bounds = array<i64: 1, 1, 128>}, {transform_indices = @transform_9, window_bounds = array<i64: 1, 1, 128>}]} {
    %c0_i32 = arith.constant 0 : i32
    %0 = arith.cmpi eq, %arg1, %c0_i32 : i32
    %1 = arith.extui %0 : i1 to i32
    %c0_i32_0 = arith.constant 0 : i32
    %2 = arith.cmpi ne, %1, %c0_i32_0 : i32
    scf.if %2 {
      %c0_27 = arith.constant 0 : index
      %c0_28 = arith.constant 0 : index
      %c0_29 = arith.constant 0 : index
      %32 = vector.load %arg3[%c0_27, %c0_28, %c0_29] : memref<1x1x256xf32, #tpu.memory_space<vmem>>, vector<1x1x256xf32>
      %c0_30 = arith.constant 0 : index
      %c0_31 = arith.constant 0 : index
      %c0_32 = arith.constant 0 : index
      %33 = vector.load %arg4[%c0_30, %c0_31, %c0_32] : memref<1x1x256xf32, #tpu.memory_space<vmem>>, vector<1x1x256xf32>
      %c0_33 = arith.constant 0 : index
      %c0_34 = arith.constant 0 : index
      %34 = vector.load %arg5[%c0_33, %c0_34] : memref<1x256xf32, #tpu.memory_space<vmem>>, vector<1x256xf32>
      %c0_35 = arith.constant 0 : index
      %c0_36 = arith.constant 0 : index
      %35 = vector.load %arg6[%c0_35, %c0_36] : memref<1x256xf32, #tpu.memory_space<vmem>>, vector<1x256xf32>
      %cst_37 = arith.constant dense<0.000000e+00> : vector<1x256xf32>
      %36 = vector.multi_reduction <add>, %32, %cst_37 [0] : vector<1x1x256xf32> to vector<1x256xf32>
      %cst_38 = arith.constant dense<0.000000e+00> : vector<1x256xf32>
      %37 = vector.multi_reduction <add>, %33, %cst_38 [0] : vector<1x1x256xf32> to vector<1x256xf32>
      %cst_39 = arith.constant 1.562500e-02 : f32
      %38 = vector.broadcast %cst_39 : f32 to vector<1x256xf32>
      %39 = arith.mulf %36, %38 : vector<1x256xf32>
      %cst_40 = arith.constant 1.562500e-02 : f32
      %40 = vector.broadcast %cst_40 : f32 to vector<1x256xf32>
      %41 = arith.mulf %37, %40 : vector<1x256xf32>
      %42 = arith.mulf %39, %39 : vector<1x256xf32>
      %43 = arith.subf %41, %42 : vector<1x256xf32>
      %cst_41 = arith.constant 0.000000e+00 : f32
      %44 = vector.broadcast %cst_41 : f32 to vector<1x256xf32>
      %45 = arith.maximumf %43, %44 : vector<1x256xf32>
      %cst_42 = arith.constant 9.99999974E-6 : f32
      %46 = vector.broadcast %cst_42 : f32 to vector<1x256xf32>
      %47 = arith.addf %45, %46 : vector<1x256xf32>
      %48 = math.rsqrt %47 : vector<1x256xf32>
      %49 = arith.mulf %34, %48 : vector<1x256xf32>
      %50 = arith.mulf %39, %49 : vector<1x256xf32>
      %51 = arith.subf %35, %50 : vector<1x256xf32>
      %c0_43 = arith.constant 0 : index
      %c0_44 = arith.constant 0 : index
      %52 = vector.load %arg12[%c0_43, %c0_44] : memref<1x256xf32, #tpu.memory_space<vmem>>, vector<1x256xf32>
      tpu.vector_store %arg12[%c0_43, %c0_44], %49 {strides = array<i32>} : memref<1x256xf32, #tpu.memory_space<vmem>>, vector<1x256xf32>,
      %c0_45 = arith.constant 0 : index
      %c0_46 = arith.constant 0 : index
      %53 = vector.load %arg13[%c0_45, %c0_46] : memref<1x256xf32, #tpu.memory_space<vmem>>, vector<1x256xf32>
      tpu.vector_store %arg13[%c0_45, %c0_46], %51 {strides = array<i32>} : memref<1x256xf32, #tpu.memory_space<vmem>>, vector<1x256xf32>,
      %cst_47 = arith.constant 0.000000e+00 : f32
      %54 = vector.broadcast %cst_47 : f32 to vector<1x1x128xf32>
      %c0_48 = arith.constant 0 : index
      %c0_49 = arith.constant 0 : index
      %c0_50 = arith.constant 0 : index
      %55 = vector.load %arg10[%c0_48, %c0_49, %c0_50] : memref<1x1x128xf32, #tpu.memory_space<vmem>>, vector<1x1x128xf32>
      tpu.vector_store %arg10[%c0_48, %c0_49, %c0_50], %54 {strides = array<i32>} : memref<1x1x128xf32, #tpu.memory_space<vmem>>, vector<1x1x128xf32>,
      %cst_51 = arith.constant 0.000000e+00 : f32
      %56 = vector.broadcast %cst_51 : f32 to vector<1x1x128xf32>
      %c0_52 = arith.constant 0 : index
      %c0_53 = arith.constant 0 : index
      %c0_54 = arith.constant 0 : index
      %57 = vector.load %arg11[%c0_52, %c0_53, %c0_54] : memref<1x1x128xf32, #tpu.memory_space<vmem>>, vector<1x1x128xf32>
      tpu.vector_store %arg11[%c0_52, %c0_53, %c0_54], %56 {strides = array<i32>} : memref<1x1x128xf32, #tpu.memory_space<vmem>>, vector<1x1x128xf32>,
    } else {
    }
    %c0 = arith.constant 0 : index
    %c0_1 = arith.constant 0 : index
    %3 = vector.load %arg2[%c0, %c0_1] : memref<64x256xbf16, #tpu.memory_space<vmem>>, vector<64x256xbf16>
    %4 = arith.extf %3 : vector<64x256xbf16> to vector<64x256xf32>
    %c0_2 = arith.constant 0 : index
    %c0_3 = arith.constant 0 : index
    %5 = vector.load %arg12[%c0_2, %c0_3] : memref<1x256xf32, #tpu.memory_space<vmem>>, vector<1x256xf32>
    %6 = vector.broadcast %5 : vector<1x256xf32> to vector<64x256xf32>
    %7 = arith.mulf %4, %6 : vector<64x256xf32>
    %c0_4 = arith.constant 0 : index
    %c0_5 = arith.constant 0 : index
    %8 = vector.load %arg13[%c0_4, %c0_5] : memref<1x256xf32, #tpu.memory_space<vmem>>, vector<1x256xf32>
    %9 = vector.broadcast %8 : vector<1x256xf32> to vector<64x256xf32>
    %10 = arith.addf %7, %9 : vector<64x256xf32>
    %cst = arith.constant 0.000000e+00 : f32
    %11 = vector.broadcast %cst : f32 to vector<64x256xf32>
    %12 = arith.maximumf %10, %11 : vector<64x256xf32>
    %13 = arith.truncf %12 : vector<64x256xf32> to vector<64x256xbf16>
    %c0_6 = arith.constant 0 : index
    %c0_7 = arith.constant 0 : index
    %14 = vector.load %arg7[%c0_6, %c0_7] : memref<256x128xbf16, #tpu.memory_space<vmem>>, vector<256x128xbf16>
    %cst_8 = arith.constant dense<0.000000e+00> : vector<64x128xf32>
    %15 = tpu.matmul %13, %14, %cst_8 {dimension_numbers = #tpu.dot_dimension_numbers<[1], [0], [0], [1], [0, 0, 1, 1], [], []>} : vector<64x256xbf16>, vector<256x128xbf16>, vector<64x128xf32> -> vector<64x128xf32>
    %c0_9 = arith.constant 0 : index
    %c0_10 = arith.constant 0 : index
    %16 = vector.load %arg8[%c0_9, %c0_10] : memref<1x128xf32, #tpu.memory_space<vmem>>, vector<1x128xf32>
    %17 = vector.broadcast %16 : vector<1x128xf32> to vector<64x128xf32>
    %18 = arith.addf %15, %17 : vector<64x128xf32>
    %19 = arith.truncf %18 : vector<64x128xf32> to vector<64x128xbf16>
    %c0_11 = arith.constant 0 : index
    %c0_12 = arith.constant 0 : index
    %20 = vector.load %arg9[%c0_11, %c0_12] : memref<64x128xbf16, #tpu.memory_space<vmem>>, vector<64x128xbf16>
    tpu.vector_store %arg9[%c0_11, %c0_12], %19 {strides = array<i32>} : memref<64x128xbf16, #tpu.memory_space<vmem>>, vector<64x128xbf16>,
    %c0_13 = arith.constant 0 : index
    %c0_14 = arith.constant 0 : index
    %c0_15 = arith.constant 0 : index
    %21 = vector.load %arg10[%c0_13, %c0_14, %c0_15] : memref<1x1x128xf32, #tpu.memory_space<vmem>>, vector<1x1x128xf32>
    %cst_16 = arith.constant dense<0.000000e+00> : vector<128xf32>
    %22 = vector.multi_reduction <add>, %18, %cst_16 [0] : vector<64x128xf32> to vector<128xf32>
    %23 = vector.shape_cast %22 : vector<128xf32> to vector<1x1x128xf32>
    %24 = arith.addf %21, %23 : vector<1x1x128xf32>
    %c0_17 = arith.constant 0 : index
    %c0_18 = arith.constant 0 : index
    %c0_19 = arith.constant 0 : index
    %25 = vector.load %arg10[%c0_17, %c0_18, %c0_19] : memref<1x1x128xf32, #tpu.memory_space<vmem>>, vector<1x1x128xf32>
    tpu.vector_store %arg10[%c0_17, %c0_18, %c0_19], %24 {strides = array<i32>} : memref<1x1x128xf32, #tpu.memory_space<vmem>>, vector<1x1x128xf32>,
    %c0_20 = arith.constant 0 : index
    %c0_21 = arith.constant 0 : index
    %c0_22 = arith.constant 0 : index
    %26 = vector.load %arg11[%c0_20, %c0_21, %c0_22] : memref<1x1x128xf32, #tpu.memory_space<vmem>>, vector<1x1x128xf32>
    %27 = arith.mulf %18, %18 : vector<64x128xf32>
    %cst_23 = arith.constant dense<0.000000e+00> : vector<128xf32>
    %28 = vector.multi_reduction <add>, %27, %cst_23 [0] : vector<64x128xf32> to vector<128xf32>
    %29 = vector.shape_cast %28 : vector<128xf32> to vector<1x1x128xf32>
    %30 = arith.addf %26, %29 : vector<1x1x128xf32>
    %c0_24 = arith.constant 0 : index
    %c0_25 = arith.constant 0 : index
    %c0_26 = arith.constant 0 : index
    %31 = vector.load %arg11[%c0_24, %c0_25, %c0_26] : memref<1x1x128xf32, #tpu.memory_space<vmem>>, vector<1x1x128xf32>
    tpu.vector_store %arg11[%c0_24, %c0_25, %c0_26], %30 {strides = array<i32>} : memref<1x1x128xf32, #tpu.memory_space<vmem>>, vector<1x1x128xf32>,
    return
  }
  func.func @transform_0(%arg0: i32, %arg1: i32) -> (i32, i32) {
    %c1_i32 = arith.constant 1 : i32
    %0 = arith.muli %arg0, %c1_i32 : i32
    %1 = arith.addi %0, %arg1 : i32
    %c0_i32 = arith.constant 0 : i32
    %c0_i32_0 = arith.constant 0 : i32
    return %1, %c0_i32 : i32, i32
  }
  func.func @transform_1(%arg0: i32, %arg1: i32) -> (i32, i32, i32) {
    %c0_i32 = arith.constant 0 : i32
    %c0_i32_0 = arith.constant 0 : i32
    %c0_i32_1 = arith.constant 0 : i32
    %c0_i32_2 = arith.constant 0 : i32
    return %c0_i32, %c0_i32_0, %c0_i32_1 : i32, i32, i32
  }
  func.func @transform_2(%arg0: i32, %arg1: i32) -> (i32, i32, i32) {
    %c0_i32 = arith.constant 0 : i32
    %c0_i32_0 = arith.constant 0 : i32
    %c0_i32_1 = arith.constant 0 : i32
    %c0_i32_2 = arith.constant 0 : i32
    return %c0_i32, %c0_i32_0, %c0_i32_1 : i32, i32, i32
  }
  func.func @transform_3(%arg0: i32, %arg1: i32) -> (i32, i32) {
    %c0_i32 = arith.constant 0 : i32
    %c0_i32_0 = arith.constant 0 : i32
    %c0_i32_1 = arith.constant 0 : i32
    return %c0_i32, %c0_i32_0 : i32, i32
  }
  func.func @transform_4(%arg0: i32, %arg1: i32) -> (i32, i32) {
    %c0_i32 = arith.constant 0 : i32
    %c0_i32_0 = arith.constant 0 : i32
    %c0_i32_1 = arith.constant 0 : i32
    return %c0_i32, %c0_i32_0 : i32, i32
  }
  func.func @transform_5(%arg0: i32, %arg1: i32) -> (i32, i32) {
    %c0_i32 = arith.constant 0 : i32
    %c0_i32_0 = arith.constant 0 : i32
    %c0_i32_1 = arith.constant 0 : i32
    return %c0_i32, %c0_i32_0 : i32, i32
  }
  func.func @transform_6(%arg0: i32, %arg1: i32) -> (i32, i32) {
    %c0_i32 = arith.constant 0 : i32
    %c0_i32_0 = arith.constant 0 : i32
    %c0_i32_1 = arith.constant 0 : i32
    return %c0_i32, %c0_i32_0 : i32, i32
  }
  func.func @transform_7(%arg0: i32, %arg1: i32) -> (i32, i32) {
    %c1_i32 = arith.constant 1 : i32
    %0 = arith.muli %arg0, %c1_i32 : i32
    %1 = arith.addi %0, %arg1 : i32
    %c0_i32 = arith.constant 0 : i32
    %c0_i32_0 = arith.constant 0 : i32
    return %1, %c0_i32 : i32, i32
  }
  func.func @transform_8(%arg0: i32, %arg1: i32) -> (i32, i32, i32) {
    %c0_i32 = arith.constant 0 : i32
    %c0_i32_0 = arith.constant 0 : i32
    %c0_i32_1 = arith.constant 0 : i32
    return %arg0, %c0_i32, %c0_i32_0 : i32, i32, i32
  }
  func.func @transform_9(%arg0: i32, %arg1: i32) -> (i32, i32, i32) {
    %c0_i32 = arith.constant 0 : i32
    %c0_i32_0 = arith.constant 0 : i32
    %c0_i32_1 = arith.constant 0 : i32
    return %arg0, %c0_i32, %c0_i32_0 : i32, i32, i32
  }
}

module attributes {stable_mosaic.version = 11 : i64} {
  func.func @bn_relu_head_kernel(%arg0: i32, %arg1: i32, %arg2: memref<64x128xbf16, #tpu.memory_space<vmem>>, %arg3: memref<1x1x128xf32, #tpu.memory_space<vmem>>, %arg4: memref<1x1x128xf32, #tpu.memory_space<vmem>>, %arg5: memref<1x128xf32, #tpu.memory_space<vmem>>, %arg6: memref<1x128xf32, #tpu.memory_space<vmem>>, %arg7: memref<1x128xf32, #tpu.memory_space<vmem>>, %arg8: memref<1x1xf32, #tpu.memory_space<vmem>>, %arg9: memref<64x1xf32, #tpu.memory_space<vmem>>, %arg10: memref<1x128xf32, #tpu.memory_space<vmem>>, %arg11: memref<1x128xf32, #tpu.memory_space<vmem>>) attributes {dimension_semantics = [#tpu.dimension_semantics<parallel>, #tpu.dimension_semantics<arbitrary>], iteration_bounds = array<i64: 1, 1>, scalar_prefetch = 0 : i64, scratch_operands = 2 : i64, tpu.core_type = #tpu.core_type<tc>, window_params = [{transform_indices = @transform_0, window_bounds = array<i64: 64, 128>}, {pipeline_mode = #tpu.pipeline_mode<synchronous>, transform_indices = @transform_1, window_bounds = array<i64: 1, 1, 128>}, {pipeline_mode = #tpu.pipeline_mode<synchronous>, transform_indices = @transform_2, window_bounds = array<i64: 1, 1, 128>}, {pipeline_mode = #tpu.pipeline_mode<synchronous>, transform_indices = @transform_3, window_bounds = array<i64: 1, 128>}, {pipeline_mode = #tpu.pipeline_mode<synchronous>, transform_indices = @transform_4, window_bounds = array<i64: 1, 128>}, {pipeline_mode = #tpu.pipeline_mode<synchronous>, transform_indices = @transform_5, window_bounds = array<i64: 1, 128>}, {pipeline_mode = #tpu.pipeline_mode<synchronous>, transform_indices = @transform_6, window_bounds = array<i64: 1, 1>}, {transform_indices = @transform_7, window_bounds = array<i64: 64, 1>}]} {
    %c0_i32 = arith.constant 0 : i32
    %0 = arith.cmpi eq, %arg1, %c0_i32 : i32
    %1 = arith.extui %0 : i1 to i32
    %c0_i32_0 = arith.constant 0 : i32
    %2 = arith.cmpi ne, %1, %c0_i32_0 : i32
    scf.if %2 {
      %c0_13 = arith.constant 0 : index
      %c0_14 = arith.constant 0 : index
      %c0_15 = arith.constant 0 : index
      %22 = vector.load %arg3[%c0_13, %c0_14, %c0_15] : memref<1x1x128xf32, #tpu.memory_space<vmem>>, vector<1x1x128xf32>
      %c0_16 = arith.constant 0 : index
      %c0_17 = arith.constant 0 : index
      %c0_18 = arith.constant 0 : index
      %23 = vector.load %arg4[%c0_16, %c0_17, %c0_18] : memref<1x1x128xf32, #tpu.memory_space<vmem>>, vector<1x1x128xf32>
      %c0_19 = arith.constant 0 : index
      %c0_20 = arith.constant 0 : index
      %24 = vector.load %arg5[%c0_19, %c0_20] : memref<1x128xf32, #tpu.memory_space<vmem>>, vector<1x128xf32>
      %c0_21 = arith.constant 0 : index
      %c0_22 = arith.constant 0 : index
      %25 = vector.load %arg6[%c0_21, %c0_22] : memref<1x128xf32, #tpu.memory_space<vmem>>, vector<1x128xf32>
      %cst_23 = arith.constant dense<0.000000e+00> : vector<1x128xf32>
      %26 = vector.multi_reduction <add>, %22, %cst_23 [0] : vector<1x1x128xf32> to vector<1x128xf32>
      %cst_24 = arith.constant dense<0.000000e+00> : vector<1x128xf32>
      %27 = vector.multi_reduction <add>, %23, %cst_24 [0] : vector<1x1x128xf32> to vector<1x128xf32>
      %cst_25 = arith.constant 1.562500e-02 : f32
      %28 = vector.broadcast %cst_25 : f32 to vector<1x128xf32>
      %29 = arith.mulf %26, %28 : vector<1x128xf32>
      %cst_26 = arith.constant 1.562500e-02 : f32
      %30 = vector.broadcast %cst_26 : f32 to vector<1x128xf32>
      %31 = arith.mulf %27, %30 : vector<1x128xf32>
      %32 = arith.mulf %29, %29 : vector<1x128xf32>
      %33 = arith.subf %31, %32 : vector<1x128xf32>
      %cst_27 = arith.constant 0.000000e+00 : f32
      %34 = vector.broadcast %cst_27 : f32 to vector<1x128xf32>
      %35 = arith.maximumf %33, %34 : vector<1x128xf32>
      %cst_28 = arith.constant 9.99999974E-6 : f32
      %36 = vector.broadcast %cst_28 : f32 to vector<1x128xf32>
      %37 = arith.addf %35, %36 : vector<1x128xf32>
      %38 = math.rsqrt %37 : vector<1x128xf32>
      %39 = arith.mulf %24, %38 : vector<1x128xf32>
      %40 = arith.mulf %29, %39 : vector<1x128xf32>
      %41 = arith.subf %25, %40 : vector<1x128xf32>
      %c0_29 = arith.constant 0 : index
      %c0_30 = arith.constant 0 : index
      %42 = vector.load %arg10[%c0_29, %c0_30] : memref<1x128xf32, #tpu.memory_space<vmem>>, vector<1x128xf32>
      tpu.vector_store %arg10[%c0_29, %c0_30], %39 {strides = array<i32>} : memref<1x128xf32, #tpu.memory_space<vmem>>, vector<1x128xf32>,
      %c0_31 = arith.constant 0 : index
      %c0_32 = arith.constant 0 : index
      %43 = vector.load %arg11[%c0_31, %c0_32] : memref<1x128xf32, #tpu.memory_space<vmem>>, vector<1x128xf32>
      tpu.vector_store %arg11[%c0_31, %c0_32], %41 {strides = array<i32>} : memref<1x128xf32, #tpu.memory_space<vmem>>, vector<1x128xf32>,
    } else {
    }
    %c0 = arith.constant 0 : index
    %c0_1 = arith.constant 0 : index
    %3 = vector.load %arg2[%c0, %c0_1] : memref<64x128xbf16, #tpu.memory_space<vmem>>, vector<64x128xbf16>
    %4 = arith.extf %3 : vector<64x128xbf16> to vector<64x128xf32>
    %c0_2 = arith.constant 0 : index
    %c0_3 = arith.constant 0 : index
    %5 = vector.load %arg10[%c0_2, %c0_3] : memref<1x128xf32, #tpu.memory_space<vmem>>, vector<1x128xf32>
    %6 = vector.broadcast %5 : vector<1x128xf32> to vector<64x128xf32>
    %7 = arith.mulf %4, %6 : vector<64x128xf32>
    %c0_4 = arith.constant 0 : index
    %c0_5 = arith.constant 0 : index
    %8 = vector.load %arg11[%c0_4, %c0_5] : memref<1x128xf32, #tpu.memory_space<vmem>>, vector<1x128xf32>
    %9 = vector.broadcast %8 : vector<1x128xf32> to vector<64x128xf32>
    %10 = arith.addf %7, %9 : vector<64x128xf32>
    %cst = arith.constant 0.000000e+00 : f32
    %11 = vector.broadcast %cst : f32 to vector<64x128xf32>
    %12 = arith.maximumf %10, %11 : vector<64x128xf32>
    %c0_6 = arith.constant 0 : index
    %c0_7 = arith.constant 0 : index
    %13 = vector.load %arg7[%c0_6, %c0_7] : memref<1x128xf32, #tpu.memory_space<vmem>>, vector<1x128xf32>
    %14 = vector.broadcast %13 : vector<1x128xf32> to vector<64x128xf32>
    %15 = arith.mulf %12, %14 : vector<64x128xf32>
    %cst_8 = arith.constant dense<0.000000e+00> : vector<64xf32>
    %16 = vector.multi_reduction <add>, %15, %cst_8 [1] : vector<64x128xf32> to vector<64xf32>
    %17 = vector.shape_cast %16 : vector<64xf32> to vector<64x1xf32>
    %c0_9 = arith.constant 0 : index
    %c0_10 = arith.constant 0 : index
    %18 = vector.load %arg8[%c0_9, %c0_10] : memref<1x1xf32, #tpu.memory_space<vmem>>, vector<1x1xf32>
    %19 = vector.broadcast %18 : vector<1x1xf32> to vector<64x1xf32>
    %20 = arith.addf %17, %19 : vector<64x1xf32>
    %c0_11 = arith.constant 0 : index
    %c0_12 = arith.constant 0 : index
    %21 = vector.load %arg9[%c0_11, %c0_12] : memref<64x1xf32, #tpu.memory_space<vmem>>, vector<64x1xf32>
    tpu.vector_store %arg9[%c0_11, %c0_12], %20 {strides = array<i32>} : memref<64x1xf32, #tpu.memory_space<vmem>>, vector<64x1xf32>,
    return
  }
  func.func @transform_0(%arg0: i32, %arg1: i32) -> (i32, i32) {
    %c1_i32 = arith.constant 1 : i32
    %0 = arith.muli %arg0, %c1_i32 : i32
    %1 = arith.addi %0, %arg1 : i32
    %c0_i32 = arith.constant 0 : i32
    %c0_i32_0 = arith.constant 0 : i32
    return %1, %c0_i32 : i32, i32
  }
  func.func @transform_1(%arg0: i32, %arg1: i32) -> (i32, i32, i32) {
    %c0_i32 = arith.constant 0 : i32
    %c0_i32_0 = arith.constant 0 : i32
    %c0_i32_1 = arith.constant 0 : i32
    %c0_i32_2 = arith.constant 0 : i32
    return %c0_i32, %c0_i32_0, %c0_i32_1 : i32, i32, i32
  }
  func.func @transform_2(%arg0: i32, %arg1: i32) -> (i32, i32, i32) {
    %c0_i32 = arith.constant 0 : i32
    %c0_i32_0 = arith.constant 0 : i32
    %c0_i32_1 = arith.constant 0 : i32
    %c0_i32_2 = arith.constant 0 : i32
    return %c0_i32, %c0_i32_0, %c0_i32_1 : i32, i32, i32
  }
  func.func @transform_3(%arg0: i32, %arg1: i32) -> (i32, i32) {
    %c0_i32 = arith.constant 0 : i32
    %c0_i32_0 = arith.constant 0 : i32
    %c0_i32_1 = arith.constant 0 : i32
    return %c0_i32, %c0_i32_0 : i32, i32
  }
  func.func @transform_4(%arg0: i32, %arg1: i32) -> (i32, i32) {
    %c0_i32 = arith.constant 0 : i32
    %c0_i32_0 = arith.constant 0 : i32
    %c0_i32_1 = arith.constant 0 : i32
    return %c0_i32, %c0_i32_0 : i32, i32
  }
  func.func @transform_5(%arg0: i32, %arg1: i32) -> (i32, i32) {
    %c0_i32 = arith.constant 0 : i32
    %c0_i32_0 = arith.constant 0 : i32
    %c0_i32_1 = arith.constant 0 : i32
    return %c0_i32, %c0_i32_0 : i32, i32
  }
  func.func @transform_6(%arg0: i32, %arg1: i32) -> (i32, i32) {
    %c0_i32 = arith.constant 0 : i32
    %c0_i32_0 = arith.constant 0 : i32
    %c0_i32_1 = arith.constant 0 : i32
    return %c0_i32, %c0_i32_0 : i32, i32
  }
  func.func @transform_7(%arg0: i32, %arg1: i32) -> (i32, i32) {
    %c1_i32 = arith.constant 1 : i32
    %0 = arith.muli %arg0, %c1_i32 : i32
    %1 = arith.addi %0, %arg1 : i32
    %c0_i32 = arith.constant 0 : i32
    %c0_i32_0 = arith.constant 0 : i32
    return %1, %c0_i32 : i32, i32
  }
}

</mosaic_0001>

<bundles_post_ra>
// kernel: critic_forward.4
= control target key start
LH: loop header
LB: loop body
LE: loop exit
PB: predicated region body
PF: predicated region fallthrough
CT: control target
= control target key end

     0   :  { %v563_v1 = vmov 0   ;;  %vm147_vm0 = vcmask 261120   ;;  %v43_v13 = vlaneseq  ;;  %v564_v15 = vmov 0.0   ;;  %s716_s1 = inlined_call_operand.vmem [shape: bf16[32,512], index: 1, kind: input, shape index: {}]   ;;  %s717_s0 = inlined_call_operand.vmem [shape: bf16[64,32], index: 0, kind: input, shape index: {}]   ;;  %s718_s3 = inlined_call_operand.vmem [shape: f32[1,1,512], index: 3, kind: output, shape index: {0}]   ;;  %s719_s4 = inlined_call_operand.vmem [shape: f32[1,1,512], index: 4, kind: output, shape index: {1}]   ;;  %s720_s2 = inlined_call_operand.vmem [shape: f32[1,512], index: 2, kind: input, shape index: {}]  }
   0x1   :  { %v547_v0 = vld [vmem:[%s716_s1 + $0x4] ss:$16 sps:$4 sm:$0xff]   ;;  %192 = vmatprep.mubr.bf16.mxu0 %v563_v1  ;;  %265 = vmatprep.mubr.bf16.mxu1 %v563_v1  ;;  %v549_v2 = vld [vmem:[%s716_s1 + $0xc] ss:$16 sps:$4 sm:$0xff]   ;;  %v551_v3 = vld [vmem:[%s716_s1] ss:$16 sps:$4 sm:$0xff]  }
   0x2   :  { %160 = vmatprep.subr.bf16.mxu0 %v547_v0  ;;  %v552_v4 = vld [vmem:[%s716_s1 + $0x8] ss:$16 sps:$4 sm:$0xff]   ;;  %233 = vmatprep.subr.bf16.mxu1 %v549_v2  ;;  %v553_v5 = vld [vmem:[%s716_s1 + $0x24] ss:$16 sps:$4 sm:$0xff]   ;;  %v555_v6 = vld [vmem:[%s716_s1 + $0x2c] ss:$16 sps:$4 sm:$0xff]  }
   0x3   :  { %161 = vmatpush1.bf16.msra.mxu0 %v551_v3  ;;  %234 = vmatpush1.bf16.msra.mxu1 %v552_v4  ;;  %v557_v7 = vld [vmem:[%s716_s1 + $0x20] ss:$16 sps:$4 sm:$0xff]   ;;  %v558_v8 = vld [vmem:[%s716_s1 + $0x28] ss:$16 sps:$4 sm:$0xff]   ;;  %vm635_vm1 = vcmp.lt.s32.totalorder %v43_v13, 512  ;;  %v68_v16 = vshrl.u32 %v43_v13, 7 }
   0x4   :  { %162 = vmatprep.subr.bf16.mxu0 %v553_v5  ;;  %235 = vmatprep.subr.bf16.mxu1 %v555_v6  ;;  %v559_v9 = vld [vmem:[%s717_s0] sm:$0xff]   ;;  %v560_v10 = vld [vmem:[%s717_s0 + $0x8] sm:$0xff]   ;;  %v561_v11 = vld [vmem:[%s717_s0 + $0x10] sm:$0xff]   ;;  %47 = vst.msk [vmem:[%s718_s3] sm:$0xf] %vm635_vm1, %v564_v15 }
   0x5   :  { %v562_v12 = vld [vmem:[%s717_s0 + $0x18] sm:$0xff]   ;;  %48 = vst.msk [vmem:[%s719_s4] sm:$0xf] %vm635_vm1, %v564_v15  ;;  %v69_v17 = vsub.s32 0, %v68_v16  ;;  %v77_v18 = vsub.s32 2, %v68_v16  ;;  %v73_v20 = vsub.s32 1, %v68_v16 }
   0x6   :  { %v65_v19 = vld [vmem:[%s720_s2] sm:$0xf]  ;;  %v81_v21 = vsub.s32 3, %v68_v16  ;;  %v565_v26 = vmov 1966171168  }
   0x7   :  { %163 = vmatpush1.bf16.msra.mxu0 %v557_v7  ;;  %236 = vmatpush1.bf16.msra.mxu1 %v558_v8  ;;  %v652_v22 = vrot.slane %v65_v19, %v69_v17  ;;  %v654_v23 = vrot.slane %v65_v19, %v77_v18  ;;  %v656_v24 = vrot.slane %v65_v19, %v73_v20  ;;  %v366_v27 = vunpack.c.l.s4 %v565_v26 }
   0x8   :  { %v658_v25 = vrot.slane %v65_v19, %v81_v21 }
   0x9   :  { %v367_v38 = vunpack.c.0.s8 %v366_v27 }
   0xa   :  { %536 = vmatmul.mubr.msk.bf16.vlgmr.msra.gmra.mrb[0].mxu0 %vm147_vm0, %v559_v9  ;;  %540 = vmatmul.mubr.msk.bf16.vlgmr.msra.gmra.mrb[0].mxu1 %vm147_vm0, %v559_v9 }
   0xb   :  { %202 = vmatprep.mubr.bf16.mxu0 %v563_v1  ;;  %275 = vmatprep.mubr.bf16.mxu1 %v563_v1  ;;  %v672_v7 = vsub.s32 %v367_v38, %v68_v16 }
  0x12   :  { %537 = vmatmul.mubr.msk.bf16.gmra.mrb[4].mxu0 %vm147_vm0, %v560_v10  ;;  %541 = vmatmul.mubr.msk.bf16.gmra.mrb[4].mxu1 %vm147_vm0, %v560_v10 }
  0x13   :  { %212 = vmatprep.mubr.bf16.mxu0 %v563_v1  ;;  %285 = vmatprep.mubr.bf16.mxu1 %v563_v1 }
  0x1a   :  { %538 = vmatmul.mubr.msk.bf16.gmra.mrb[8].mxu0 %vm147_vm0, %v561_v11  ;;  %542 = vmatmul.mubr.msk.bf16.gmra.mrb[8].mxu1 %vm147_vm0, %v561_v11 }
  0x1b   :  { %222 = vmatprep.mubr.bf16.mxu0 %v563_v1  ;;  %295 = vmatprep.mubr.bf16.mxu1 %v563_v1 }
  0x22   :  { %539 = vmatmul.mubr.msk.bf16.gmra.mrb[12].mxu0 %vm147_vm0, %v562_v12  ;;  %543 = vmatmul.mubr.msk.bf16.gmra.mrb[12].mxu1 %vm147_vm0, %v562_v12 }
  0xdd   :  { %v194_v28 = vpop.f32.mrb[0].mxu0  ;;  %v267_v29 = vpop.f32.mrb[0].mxu1 }
  0xde   :  { %v195_v30 = vadd.f32 %v194_v28, %v652_v22  ;;  %v268_v31 = vadd.f32 %v267_v29, %v654_v23  ;;  %v196_v32 = vpop.f32.mrb[1].mxu0  ;;  %v269_v33 = vpop.f32.mrb[1].mxu1 }
  0xdf   :  { %v197_v34 = vadd.f32 %v196_v32, %v656_v24  ;;  %v270_v35 = vadd.f32 %v269_v33, %v658_v25  ;;  %v198_v36 = vpop.f32.mrb[2].mxu0  ;;  %v271_v37 = vpop.f32.mrb[2].mxu1 }
  0xe0   :  { %v395_v39 = vmul.f32 %v195_v30, %v195_v30  ;;  %v397_v40 = vmul.f32 %v268_v31, %v268_v31  ;;  %v199_v41 = vadd.f32 %v198_v36, %v652_v22  ;;  %v272_v42 = vadd.f32 %v271_v37, %v654_v23  ;;  %v200_v43 = vpop.f32.mrb[3].mxu0  ;;  %v273_v44 = vpop.f32.mrb[3].mxu1 }
  0xe1   :  { %v396_v45 = vmul.f32 %v197_v34, %v197_v34  ;;  %v398_v46 = vmul.f32 %v270_v35, %v270_v35  ;;  %v201_v47 = vadd.f32 %v200_v43, %v656_v24  ;;  %v274_v48 = vadd.f32 %v273_v44, %v658_v25 }
  0xe2   :  { %v307_v49 = vadd.f32 %v199_v41, %v195_v30  ;;  %v399_v50 = vmul.f32 %v199_v41, %v199_v41  ;;  %v333_v51 = vadd.f32 %v272_v42, %v268_v31  ;;  %v401_v52 = vmul.f32 %v272_v42, %v272_v42 }
  0xe3   :  { %v320_v53 = vadd.f32 %v201_v47, %v197_v34  ;;  %v400_v54 = vmul.f32 %v201_v47, %v201_v47  ;;  %v346_v55 = vadd.f32 %v274_v48, %v270_v35  ;;  %v402_v56 = vmul.f32 %v274_v48, %v274_v48 }
  0xe4   :  { %v427_v57 = vadd.f32 %v399_v50, %v395_v39  ;;  %v453_v58 = vadd.f32 %v401_v52, %v397_v40 }
  0xe5   :  { %v440_v59 = vadd.f32 %v400_v54, %v396_v45  ;;  %v466_v60 = vadd.f32 %v402_v56, %v398_v46  ;;  %v204_v61 = vpop.f32.mrb[4].mxu0  ;;  %v277_v62 = vpop.f32.mrb[4].mxu1 }
  0xe6   :  { %v205_v63 = vadd.f32 %v204_v61, %v652_v22  ;;  %v278_v0 = vadd.f32 %v277_v62, %v654_v23  ;;  %v206_v1 = vpop.f32.mrb[5].mxu0  ;;  %v279_v2 = vpop.f32.mrb[5].mxu1 }
  0xe7   :  { %v207_v3 = vadd.f32 %v206_v1, %v656_v24  ;;  %v280_v4 = vadd.f32 %v279_v2, %v658_v25  ;;  %v208_v5 = vpop.f32.mrb[6].mxu0  ;;  %v281_v6 = vpop.f32.mrb[6].mxu1 }
  0xe8   :  { %v308_v8 = vadd.f32 %v307_v49, %v205_v63  ;;  %v403_v9 = vmul.f32 %v205_v63, %v205_v63  ;;  %v334_v10 = vadd.f32 %v333_v51, %v278_v0  ;;  %v405_v11 = vmul.f32 %v278_v0, %v278_v0  ;;  %v210_v12 = vpop.f32.mrb[7].mxu0  ;;  %v283_v13 = vpop.f32.mrb[7].mxu1 }
  0xe9   :  { %v321_v15 = vadd.f32 %v320_v53, %v207_v3  ;;  %v404_v17 = vmul.f32 %v207_v3, %v207_v3  ;;  %v347_v18 = vadd.f32 %v346_v55, %v280_v4  ;;  %v406_v19 = vmul.f32 %v280_v4, %v280_v4 }
  0xea   :  { %v428_v20 = vadd.f32 %v427_v57, %v403_v9  ;;  %v454_v21 = vadd.f32 %v453_v58, %v405_v11  ;;  %v209_v26 = vadd.f32 %v208_v5, %v652_v22  ;;  %v282_v27 = vadd.f32 %v281_v6, %v654_v23 }
  0xeb   :  { %v441_v28 = vadd.f32 %v440_v59, %v404_v17  ;;  %v467_v29 = vadd.f32 %v466_v60, %v406_v19  ;;  %v211_v16 = vadd.f32 %v210_v12, %v656_v24  ;;  %v284_v30 = vadd.f32 %v283_v13, %v658_v25 }
  0xec   :  { %v309_v31 = vadd.f32 %v308_v8, %v209_v26  ;;  %v407_v32 = vmul.f32 %v209_v26, %v209_v26  ;;  %v335_v33 = vadd.f32 %v334_v10, %v282_v27  ;;  %v409_v34 = vmul.f32 %v282_v27, %v282_v27 }
  0xed   :  { %v322_v35 = vadd.f32 %v321_v15, %v211_v16  ;;  %v408_v36 = vmul.f32 %v211_v16, %v211_v16  ;;  %v348_v37 = vadd.f32 %v347_v18, %v284_v30  ;;  %v410_v38 = vmul.f32 %v284_v30, %v284_v30  ;;  %v214_v39 = vpop.f32.mrb[8].mxu0  ;;  %v287_v40 = vpop.f32.mrb[8].mxu1 }
  0xee   :  { %v429_v41 = vadd.f32 %v428_v20, %v407_v32  ;;  %v455_v42 = vadd.f32 %v454_v21, %v409_v34  ;;  %v215_v43 = vadd.f32 %v214_v39, %v652_v22  ;;  %v288_v44 = vadd.f32 %v287_v40, %v654_v23  ;;  %v216_v45 = vpop.f32.mrb[9].mxu0  ;;  %v289_v46 = vpop.f32.mrb[9].mxu1 }
  0xef   :  { %v442_v47 = vadd.f32 %v441_v28, %v408_v36  ;;  %v468_v48 = vadd.f32 %v467_v29, %v410_v38  ;;  %v217_v49 = vadd.f32 %v216_v45, %v656_v24  ;;  %v290_v50 = vadd.f32 %v289_v46, %v658_v25  ;;  %v218_v51 = vpop.f32.mrb[10].mxu0  ;;  %v291_v52 = vpop.f32.mrb[10].mxu1 }
  0xf0   :  { %v310_v53 = vadd.f32 %v309_v31, %v215_v43  ;;  %v411_v54 = vmul.f32 %v215_v43, %v215_v43  ;;  %v336_v55 = vadd.f32 %v335_v33, %v288_v44  ;;  %v413_v56 = vmul.f32 %v288_v44, %v288_v44  ;;  %v220_v57 = vpop.f32.mrb[11].mxu0  ;;  %v293_v58 = vpop.f32.mrb[11].mxu1 }
  0xf1   :  { %v323_v59 = vadd.f32 %v322_v35, %v217_v49  ;;  %v412_v60 = vmul.f32 %v217_v49, %v217_v49  ;;  %v349_v61 = vadd.f32 %v348_v37, %v290_v50  ;;  %v414_v62 = vmul.f32 %v290_v50, %v290_v50 }
  0xf2   :  { %v430_v63 = vadd.f32 %v429_v41, %v411_v54  ;;  %v456_v0 = vadd.f32 %v455_v42, %v413_v56  ;;  %v219_v1 = vadd.f32 %v218_v51, %v652_v22  ;;  %v292_v2 = vadd.f32 %v291_v52, %v654_v23 }
  0xf3   :  { %v443_v3 = vadd.f32 %v442_v47, %v412_v60  ;;  %v469_v4 = vadd.f32 %v468_v48, %v414_v62  ;;  %v221_v5 = vadd.f32 %v220_v57, %v656_v24  ;;  %v294_v6 = vadd.f32 %v293_v58, %v658_v25 }
  0xf4   :  { %v311_v8 = vadd.f32 %v310_v53, %v219_v1  ;;  %v415_v9 = vmul.f32 %v219_v1, %v219_v1  ;;  %v337_v10 = vadd.f32 %v336_v55, %v292_v2  ;;  %v417_v11 = vmul.f32 %v292_v2, %v292_v2 }
  0xf5   :  { %v324_v12 = vadd.f32 %v323_v59, %v221_v5  ;;  %v416_v13 = vmul.f32 %v221_v5, %v221_v5  ;;  %v350_v15 = vadd.f32 %v349_v61, %v294_v6  ;;  %v418_v17 = vmul.f32 %v294_v6, %v294_v6  ;;  %v224_v18 = vpop.f32.mrb[12].mxu0  ;;  %v297_v19 = vpop.f32.mrb[12].mxu1 }
  0xf6   :  { %v431_v20 = vadd.f32 %v430_v63, %v415_v9  ;;  %v457_v21 = vadd.f32 %v456_v0, %v417_v11  ;;  %v225_v26 = vadd.f32 %v224_v18, %v652_v22  ;;  %v298_v27 = vadd.f32 %v297_v19, %v654_v23  ;;  %v226_v28 = vpop.f32.mrb[13].mxu0  ;;  %v299_v29 = vpop.f32.mrb[13].mxu1 }
  0xf7   :  { %v444_v16 = vadd.f32 %v443_v3, %v416_v13  ;;  %v470_v30 = vadd.f32 %v469_v4, %v418_v17  ;;  %v227_v31 = vadd.f32 %v226_v28, %v656_v24  ;;  %v300_v32 = vadd.f32 %v299_v29, %v658_v25  ;;  %v228_v33 = vpop.f32.mrb[14].mxu0  ;;  %v301_v34 = vpop.f32.mrb[14].mxu1 }
  0xf8   :  { %v312_v35 = vadd.f32 %v311_v8, %v225_v26  ;;  %v419_v36 = vmul.f32 %v225_v26, %v225_v26  ;;  %v338_v37 = vadd.f32 %v337_v10, %v298_v27  ;;  %v421_v38 = vmul.f32 %v298_v27, %v298_v27  ;;  %v230_v39 = vpop.f32.mrb[15].mxu0  ;;  %v303_v40 = vpop.f32.mrb[15].mxu1 }
  0xf9   :  { %v325_v41 = vadd.f32 %v324_v12, %v227_v31  ;;  %v420_v42 = vmul.f32 %v227_v31, %v227_v31  ;;  %v351_v43 = vadd.f32 %v350_v15, %v300_v32  ;;  %v422_v44 = vmul.f32 %v300_v32, %v300_v32 }
  0xfa   :  { %v432_v45 = vadd.f32 %v431_v20, %v419_v36  ;;  %v458_v46 = vadd.f32 %v457_v21, %v421_v38  ;;  %v229_v47 = vadd.f32 %v228_v33, %v652_v22  ;;  %v302_v48 = vadd.f32 %v301_v34, %v654_v23 }
  0xfb   :  { %v445_v49 = vadd.f32 %v444_v16, %v420_v42  ;;  %v471_v50 = vadd.f32 %v470_v30, %v422_v44  ;;  %v231_v51 = vadd.f32 %v230_v39, %v656_v24  ;;  %v304_v52 = vadd.f32 %v303_v40, %v658_v25 }
  0xfc   :  { %v313_v53 = vadd.f32 %v312_v35, %v229_v47  ;;  %v423_v54 = vmul.f32 %v229_v47, %v229_v47  ;;  %v339_v55 = vadd.f32 %v338_v37, %v302_v48  ;;  %v425_v56 = vmul.f32 %v302_v48, %v302_v48 }
  0xfd   :  { %v326_v57 = vadd.f32 %v325_v41, %v231_v51  ;;  %v424_v58 = vmul.f32 %v231_v51, %v231_v51  ;;  %v352_v59 = vadd.f32 %v351_v43, %v304_v52  ;;  %v426_v60 = vmul.f32 %v304_v52, %v304_v52 }
  0xfe   :  { %v314_v61 = vrot.slane %v313_v53, 4  ;;  %v433_v62 = vadd.f32 %v432_v45, %v423_v54  ;;  %v340_v63 = vrot.slane %v339_v55, 4  ;;  %v459_v22 = vadd.f32 %v458_v46, %v425_v56 }
  0xff   :  { %v327_v0 = vrot.slane %v326_v57, 4  ;;  %v446_v23 = vadd.f32 %v445_v49, %v424_v58  ;;  %v353_v1 = vrot.slane %v352_v59, 4  ;;  %v472_v2 = vadd.f32 %v471_v50, %v426_v60  ;;  %v306_v60 = vld [vmem:[%s718_s3] sm:$0xf] }
 0x100   :  { %v315_v3 = vadd.f32 %v314_v61, %v313_v53  ;;  %v434_v24 = vrot.slane %v433_v62, 4  ;;  %v341_v4 = vadd.f32 %v340_v63, %v339_v55  ;;  %v460_v25 = vrot.slane %v459_v22, 4  ;;  %v394_v63 = vld [vmem:[%s719_s4] sm:$0xf] }
 0x101   :  { %v328_v5 = vadd.f32 %v327_v0, %v326_v57  ;;  %v447_v6 = vrot.slane %v446_v23, 4  ;;  %v354_v8 = vadd.f32 %v353_v1, %v352_v59  ;;  %v473_v9 = vrot.slane %v472_v2, 4 }
 0x102   :  { %v316_v10 = vrot.slane %v315_v3, 2  ;;  %v435_v11 = vadd.f32 %v434_v24, %v433_v62  ;;  %v342_v12 = vrot.slane %v341_v4, 2  ;;  %v461_v13 = vadd.f32 %v460_v25, %v459_v22 }
 0x103   :  { %v329_v15 = vrot.slane %v328_v5, 2  ;;  %v448_v17 = vadd.f32 %v447_v6, %v446_v23  ;;  %v355_v18 = vrot.slane %v354_v8, 2  ;;  %v474_v19 = vadd.f32 %v473_v9, %v472_v2 }
 0x104   :  { %v317_v20 = vadd.f32 %v316_v10, %v315_v3  ;;  %v436_v21 = vrot.slane %v435_v11, 2  ;;  %v343_v26 = vadd.f32 %v342_v12, %v341_v4  ;;  %v462_v27 = vrot.slane %v461_v13, 2 }
 0x105   :  { %v330_v28 = vadd.f32 %v329_v15, %v328_v5  ;;  %v449_v29 = vrot.slane %v448_v17, 2  ;;  %v356_v16 = vadd.f32 %v355_v18, %v354_v8  ;;  %v475_v30 = vrot.slane %v474_v19, 2 }
 0x106   :  { %v318_v31 = vrot.slane %v317_v20, 1  ;;  %v437_v32 = vadd.f32 %v436_v21, %v435_v11  ;;  %v344_v33 = vrot.slane %v343_v26, 1  ;;  %v463_v34 = vadd.f32 %v462_v27, %v461_v13 }
 0x107   :  { %v331_v35 = vrot.slane %v330_v28, 1  ;;  %v450_v36 = vadd.f32 %v449_v29, %v448_v17  ;;  %v357_v37 = vrot.slane %v356_v16, 1  ;;  %v476_v38 = vadd.f32 %v475_v30, %v474_v19 }
 0x108   :  { %v319_v39 = vadd.f32 %v318_v31, %v317_v20  ;;  %v438_v40 = vrot.slane %v437_v32, 1  ;;  %v345_v41 = vadd.f32 %v344_v33, %v343_v26  ;;  %v464_v42 = vrot.slane %v463_v34, 1 }
 0x109   :  { %v332_v43 = vadd.f32 %v331_v35, %v330_v28  ;;  %v451_v44 = vrot.slane %v450_v36, 1  ;;  %v358_v45 = vadd.f32 %v357_v37, %v356_v16  ;;  %v477_v46 = vrot.slane %v476_v38, 1 }
 0x10a   :  { %v439_v47 = vadd.f32 %v438_v40, %v437_v32  ;;  %v465_v48 = vadd.f32 %v464_v42, %v463_v34 }
 0x10b   :  { %v363_v49 = vcombine.low %v319_v39, %v332_v43  ;;  %v452_v50 = vadd.f32 %v451_v44, %v450_v36  ;;  %v364_v51 = vcombine.low %v345_v41, %v358_v45  ;;  %v478_v52 = vadd.f32 %v477_v46, %v476_v38 }
 0x10d   :  { %v371_v53 = vrot.slane %v363_v49, %v672_v7  ;;  %v483_v54 = vcombine.low %v439_v47, %v452_v50  ;;  %v378_v55 = vrot.slane %v364_v51, %v672_v7  ;;  %v484_v56 = vcombine.low %v465_v48, %v478_v52 }
 0x10f   :  { %v491_v57 = vrot.slane %v483_v54, %v672_v7  ;;  %v379_v58 = vcombine.low %v371_v53, %v378_v55  ;;  %v498_v59 = vrot.slane %v484_v56, %v672_v7 }
 0x111   :  { %v386_v61 = vrot.slane %v379_v58, %v672_v7  ;;  %v499_v62 = vcombine.low %v491_v57, %v498_v59 }
 0x113   :  { %v388_v22 = vadd.f32 %v386_v61, %v306_v60  ;;  %v506_v0 = vrot.slane %v499_v62, %v672_v7 }
 0x115   :  { %393 = vst.msk [vmem:[%s718_s3] sm:$0xf] %vm635_vm1, %v388_v22  ;;  %v508_v23 = vadd.f32 %v506_v0, %v394_v63 }
 0x117   :  { %509 = vst.msk [vmem:[%s719_s4] sm:$0xf] %vm635_vm1, %v508_v23 }

// kernel: critic_forward.6
= control target key start
LH: loop header
LB: loop body
LE: loop exit
PB: predicated region body
PF: predicated region fallthrough
CT: control target
= control target key end

     0   :  { %v89_v24 = vlaneseq  ;;  %s828_s5 = inlined_call_operand.vmem [shape: bf16[256,128], index: 5, kind: input, shape index: {}]   ;;  %s829_s1 = inlined_call_operand.vmem [shape: f32[1,1,256], index: 1, kind: input, shape index: {}]   ;;  %s830_s2 = inlined_call_operand.vmem [shape: f32[1,1,256], index: 2, kind: input, shape index: {}]   ;;  %s831_s3 = inlined_call_operand.vmem [shape: f32[1,256], index: 3, kind: input, shape index: {}]   ;;  %s832_s4 = inlined_call_operand.vmem [shape: f32[1,256], index: 4, kind: input, shape index: {}]   ;;  %s833_s0 = inlined_call_operand.vmem [shape: bf16[64,256], index: 0, kind: input, shape index: {}]   ;;  %s834_s8 = inlined_call_operand.vmem [shape: f32[1,1,128], index: 8, kind: output, shape index: {1}]   ;;  %s835_s9 = inlined_call_operand.vmem [shape: f32[1,1,128], index: 9, kind: output, shape index: {2}]   ;;  %s836_s6 = inlined_call_operand.vmem [shape: f32[1,128], index: 6, kind: input, shape index: {}]   ;;  %s837_s7 = inlined_call_operand.vmem [shape: bf16[64,128], index: 7, kind: output, shape index: {0}]  }
   0x1   :  { %v634_v0 = vld [vmem:[%s828_s5 + $0x40] sm:$0xff]   ;;  %v636_v2 = vld [vmem:[%s828_s5 + $0x48] sm:$0xff]   ;;  %v638_v4 = vld [vmem:[%s828_s5 + $0x50] sm:$0xff]  }
   0x2   :  { %v635_v1 = vld [vmem:[%s828_s5] sm:$0xff]   ;;  %577 = vmatprep.subr.bf16.mxu0 %v634_v0  ;;  %617 = vmatprep.subr.bf16.mxu1 %v634_v0  ;;  %v637_v3 = vld [vmem:[%s828_s5 + $0x8] sm:$0xff]   ;;  %v639_v5 = vld [vmem:[%s828_s5 + $0x10] sm:$0xff]   ;;  %vm91_vm0 = vcmp.lt.s32.totalorder %v89_v24, 256  ;;  %v124_v30 = vshrl.u32 %v89_v24, 7 }
   0x3   :  { %578 = vmatpush3.bf16.msra.mxu0 %v635_v1  ;;  %625 = vmatpush3.bf16.msra.mxu1 %v635_v1  ;;  %v640_v6 = vld [vmem:[%s828_s5 + $0x58] sm:$0xff]   ;;  %v642_v8 = vld [vmem:[%s828_s5 + $0x60] sm:$0xff]   ;;  %v644_v10 = vld [vmem:[%s828_s5 + $0x68] sm:$0xff]  }
   0x4   :  { %579 = vmatprep.subr.bf16.mxu0 %v636_v2  ;;  %618 = vmatprep.subr.bf16.mxu1 %v636_v2  ;;  %v641_v7 = vld [vmem:[%s828_s5 + $0x18] sm:$0xff]   ;;  %v643_v9 = vld [vmem:[%s828_s5 + $0x20] sm:$0xff]   ;;  %v645_v15 = vld [vmem:[%s828_s5 + $0x28] sm:$0xff]   ;;  %v125_v35 = vsub.s32 0, %v124_v30  ;;  %v129_v36 = vsub.s32 1, %v124_v30 }
   0x5   :  { %v73_v11 = vld [vmem:[%s829_s1] sm:$0x3]  ;;  %v646_v17 = vld [vmem:[%s828_s5 + $0x70] sm:$0xff]   ;;  %v648_v21 = vld [vmem:[%s828_s5 + $0x78] sm:$0xff]  }
   0x6   :  { %v74_v12 = vld [vmem:[%s830_s2] sm:$0x3]  ;;  %v79_v13 = vmul.f32 0.015625, %v73_v11  ;;  %v647_v19 = vld [vmem:[%s828_s5 + $0x30] sm:$0xff]   ;;  %v649_v23 = vld [vmem:[%s828_s5 + $0x38] sm:$0xff]  }
   0x7   :  { %580 = vmatpush3.bf16.msra.mxu0 %v637_v3  ;;  %626 = vmatpush3.bf16.msra.mxu1 %v637_v3  ;;  %v80_v14 = vmul.f32 0.015625, %v74_v12  ;;  %v75_v25 = vld [vmem:[%s831_s3] sm:$0x3]  ;;  %v98_v33 = vld [vmem:[%s833_s0 + $0x8] sm:$0xff]  ;;  %v99_v38 = vld [vmem:[%s833_s0 + $0x10] sm:$0xff] }
   0x8   :  { %581 = vmatprep.subr.bf16.mxu0 %v638_v4  ;;  %619 = vmatprep.subr.bf16.mxu1 %v638_v4  ;;  %v81_v16 = vmul.f32 %v79_v13, %v79_v13  ;;  %v76_v28 = vld [vmem:[%s832_s4] sm:$0x3]  ;;  %v102_v37 = vld [vmem:[%s833_s0 + $0x28] sm:$0xff]  ;;  %v100_v39 = vld [vmem:[%s833_s0 + $0x18] sm:$0xff]  ;;  %v107_v42 = vunpack.c.l.bf16 %v98_v33  ;;  %v108_v43 = vunpack.c.h.bf16 %v98_v33  ;;  %v110_v51 = vunpack.c.h.bf16 %v99_v38 }
   0x9   :  { %v97_v32 = vld [vmem:[%s833_s0] sm:$0xff]  ;;  %v784_v46 = vld [vmem:[%s833_s0 + $0x30] sm:$0xff]  ;;  %v789_v47 = vld [vmem:[%s833_s0 + $0x38] sm:$0xff]  ;;  %v115_v49 = vunpack.c.l.bf16 %v102_v37  ;;  %v116_v50 = vunpack.c.h.bf16 %v102_v37  ;;  %v112_v52 = vunpack.c.h.bf16 %v100_v39  ;;  %v109_v55 = vunpack.c.l.bf16 %v99_v38 }
   0xa   :  { %v82_v18 = vsub.f32 %v80_v14, %v81_v16  ;;  %v101_v34 = vld [vmem:[%s833_s0 + $0x20] sm:$0xff]  ;;  %v105_v40 = vunpack.c.l.bf16 %v97_v32  ;;  %v106_v41 = vunpack.c.h.bf16 %v97_v32  ;;  %v111_v56 = vunpack.c.l.bf16 %v100_v39 }
   0xb   :  { %582 = vmatpush3.bf16.msra.mxu0 %v639_v5  ;;  %627 = vmatpush3.bf16.msra.mxu1 %v639_v5  ;;  %v113_v44 = vunpack.c.l.bf16 %v101_v34  ;;  %v114_v45 = vunpack.c.h.bf16 %v101_v34  ;;  %v118_v57 = vunpack.c.h.bf16 %v784_v46  ;;  %v120_v58 = vunpack.c.h.bf16 %v789_v47 }
   0xc   :  { %583 = vmatprep.subr.bf16.mxu0 %v640_v6  ;;  %620 = vmatprep.subr.bf16.mxu1 %v640_v6  ;;  %v83_v20 = vmax.f32 %v82_v18, 0.0  ;;  %v117_v59 = vunpack.c.l.bf16 %v784_v46  ;;  %v119_v60 = vunpack.c.l.bf16 %v789_v47 }
   0xe   :  { %v84_v22 = vadd.f32 1e-05, %v83_v20 }
   0xf   :  { %584 = vmatpush3.bf16.msra.mxu0 %v641_v7  ;;  %628 = vmatpush3.bf16.msra.mxu1 %v641_v7 }
  0x10   :  { %585 = vmatprep.subr.bf16.mxu0 %v642_v8  ;;  %621 = vmatprep.subr.bf16.mxu1 %v642_v8  ;;  %650 = vrsqrt.f32 %v84_v22 }
  0x13   :  { %586 = vmatpush3.bf16.msra.mxu0 %v643_v9  ;;  %629 = vmatpush3.bf16.msra.mxu1 %v643_v9 }
  0x14   :  { %587 = vmatprep.subr.bf16.mxu0 %v644_v10  ;;  %622 = vmatprep.subr.bf16.mxu1 %v644_v10 }
  0x17   :  { %588 = vmatpush3.bf16.msra.mxu0 %v645_v15  ;;  %630 = vmatpush3.bf16.msra.mxu1 %v645_v15 }
  0x18   :  { %589 = vmatprep.subr.bf16.mxu0 %v646_v17  ;;  %623 = vmatprep.subr.bf16.mxu1 %v646_v17 }
  0x1a   :  { %v651_v26 = vpop.eup %650 }
  0x1b   :  { %590 = vmatpush3.bf16.msra.mxu0 %v647_v19  ;;  %631 = vmatpush3.bf16.msra.mxu1 %v647_v19  ;;  %v86_v27 = vmul.f32 %v651_v26, %v75_v25 }
  0x1c   :  { %591 = vmatprep.subr.bf16.mxu0 %v648_v21  ;;  %624 = vmatprep.subr.bf16.mxu1 %v648_v21 }
  0x1d   :  { %v87_v29 = vmul.f32 %v86_v27, %v79_v13  ;;  %93 = vst.msk [vmem:[#allocation2] sm:$0x3] %vm91_vm0, %v86_v27 }
  0x1f   :  { %592 = vmatpush3.bf16.msra.mxu0 %v649_v23  ;;  %632 = vmatpush3.bf16.msra.mxu1 %v649_v23  ;;  %v88_v31 = vsub.f32 %v76_v28, %v87_v29 }
  0x21   :  { %94 = vst.msk [vmem:[#allocation3] sm:$0x3] %vm91_vm0, %v88_v31 }
  0x24   :  { %v121_v48 = vld [vmem:[#allocation2] sm:$0x3] }
  0x25   :  { %v126_v53 = vrot.slane %v121_v48, %v125_v35  ;;  %v130_v54 = vrot.slane %v121_v48, %v129_v36 }
  0x27   :  { %v134_v61 = vmul.f32 %v130_v54, %v106_v41  ;;  %v136_v62 = vmul.f32 %v130_v54, %v108_v43  ;;  %v133_v63 = vmul.f32 %v126_v53, %v105_v40  ;;  %v135_v0 = vmul.f32 %v126_v53, %v107_v42 }
  0x28   :  { %v149_v1 = vld [vmem:[#allocation3] sm:$0x3]  ;;  %v142_v2 = vmul.f32 %v130_v54, %v114_v45  ;;  %v144_v3 = vmul.f32 %v130_v54, %v116_v50  ;;  %v141_v4 = vmul.f32 %v126_v53, %v113_v44  ;;  %v143_v5 = vmul.f32 %v126_v53, %v115_v49 }
  0x29   :  { %v154_v6 = vrot.slane %v149_v1, %v125_v35  ;;  %v158_v7 = vrot.slane %v149_v1, %v129_v36  ;;  %v138_v8 = vmul.f32 %v130_v54, %v110_v51  ;;  %v140_v9 = vmul.f32 %v130_v54, %v112_v52 }
  0x2a   :  { %v137_v10 = vmul.f32 %v126_v53, %v109_v55  ;;  %v139_v11 = vmul.f32 %v126_v53, %v111_v56  ;;  %v146_v12 = vmul.f32 %v130_v54, %v118_v57  ;;  %v148_v13 = vmul.f32 %v130_v54, %v120_v58  ;;  %v521_v58 = vld [vmem:[%s836_s6] ss:$0 sm:$0xff] }
  0x2b   :  { %v162_v14 = vadd.f32 %v158_v7, %v134_v61  ;;  %v164_v15 = vadd.f32 %v158_v7, %v136_v62  ;;  %v161_v16 = vadd.f32 %v154_v6, %v133_v63  ;;  %v163_v17 = vadd.f32 %v154_v6, %v135_v0 }
  0x2c   :  { %v170_v18 = vadd.f32 %v158_v7, %v142_v2  ;;  %v172_v19 = vadd.f32 %v158_v7, %v144_v3  ;;  %v169_v20 = vadd.f32 %v154_v6, %v141_v4  ;;  %v171_v21 = vadd.f32 %v154_v6, %v143_v5 }
  0x2d   :  { %v178_v22 = vmax.f32 %v162_v14, 0.0  ;;  %v180_v23 = vmax.f32 %v164_v15, 0.0  ;;  %v177_v24 = vmax.f32 %v161_v16, 0.0  ;;  %v179_v25 = vmax.f32 %v163_v17, 0.0 }
  0x2e   :  { %v186_v26 = vmax.f32 %v170_v18, 0.0  ;;  %v188_v27 = vmax.f32 %v172_v19, 0.0  ;;  %v185_v28 = vmax.f32 %v169_v20, 0.0  ;;  %v187_v29 = vmax.f32 %v171_v21, 0.0 }
  0x2f   :  { %v194_v30 = vpack.c.bf16 %v180_v23, %v178_v22  ;;  %v193_v31 = vpack.c.bf16 %v179_v25, %v177_v24  ;;  %v166_v32 = vadd.f32 %v158_v7, %v138_v8  ;;  %v168_v33 = vadd.f32 %v158_v7, %v140_v9 }
  0x30   :  { %v198_v34 = vpack.c.bf16 %v188_v27, %v186_v26  ;;  %v197_v35 = vpack.c.bf16 %v187_v29, %v185_v28  ;;  %v165_v36 = vadd.f32 %v154_v6, %v137_v10  ;;  %v167_v37 = vadd.f32 %v154_v6, %v139_v11 }
  0x31   :  { %368 = vmatprep.mubr.bf16.mxu0 %v194_v30  ;;  %v182_v38 = vmax.f32 %v166_v32, 0.0  ;;  %v184_v39 = vmax.f32 %v168_v33, 0.0  ;;  %v174_v40 = vadd.f32 %v158_v7, %v146_v12  ;;  %v176_v41 = vadd.f32 %v158_v7, %v148_v13 }
  0x32   :  { %369 = vmatmul.mubr.bf16.vlgmr.msra.gmra.mrb[0].mxu0 %v193_v31  ;;  %384 = vmatprep.mubr.bf16.mxu1 %v198_v34  ;;  %v181_v42 = vmax.f32 %v165_v36, 0.0  ;;  %v183_v43 = vmax.f32 %v167_v37, 0.0  ;;  %v145_v44 = vmul.f32 %v126_v53, %v117_v59  ;;  %v147_v45 = vmul.f32 %v126_v53, %v119_v60 }
  0x33   :  { %385 = vmatmul.mubr.bf16.vlgmr.msra.gmra.mrb[0].mxu1 %v197_v35  ;;  %v196_v46 = vpack.c.bf16 %v184_v39, %v182_v38  ;;  %v190_v47 = vmax.f32 %v174_v40, 0.0  ;;  %v192_v48 = vmax.f32 %v176_v41, 0.0  ;;  %v652_v57 = vmov 0.0  }
  0x34   :  { %v173_v49 = vadd.f32 %v154_v6, %v145_v44  ;;  %v175_v50 = vadd.f32 %v154_v6, %v147_v45  ;;  %v195_v52 = vpack.c.bf16 %v183_v43, %v181_v42  ;;  %95 = vst [vmem:[%s834_s8] sm:$0x1] %v652_v57  ;;  %96 = vst [vmem:[%s835_s9] sm:$0x1] %v652_v57 }
  0x35   :  { %376 = vmatprep.mubr.bf16.mxu0 %v196_v46  ;;  %v200_v51 = vpack.c.bf16 %v192_v48, %v190_v47 }
  0x36   :  { %v189_v54 = vmax.f32 %v173_v49, 0.0  ;;  %v191_v55 = vmax.f32 %v175_v50, 0.0 }
  0x37   :  { %392 = vmatprep.mubr.bf16.mxu1 %v200_v51 }
  0x38   :  { %v199_v56 = vpack.c.bf16 %v191_v55, %v189_v54 }
  0x3a   :  { %377 = vmatmul.mubr.bf16.gmra.mrb[4].mxu0 %v195_v52 }
  0x3b   :  { %393 = vmatmul.mubr.bf16.gmra.mrb[4].mxu1 %v199_v56 }
 0x105   :  { %v593_v53 = vpop.f32.mrb[0].mxu0 }
 0x106   :  { %v594_v59 = vpop.f32.mrb[1].mxu0  ;;  %v605_v60 = vpop.f32.mrb[0].mxu1 }
 0x107   :  { %v595_v61 = vadd.f32 %v594_v59, %v593_v53  ;;  %v596_v62 = vpop.f32.mrb[2].mxu0  ;;  %v606_v63 = vpop.f32.mrb[1].mxu1 }
 0x108   :  { %v597_v0 = vpop.f32.mrb[3].mxu0  ;;  %v607_v1 = vadd.f32 %v606_v63, %v605_v60  ;;  %v608_v2 = vpop.f32.mrb[2].mxu1 }
 0x109   :  { %v371_v3 = vadd.f32 %v595_v61, %v521_v58  ;;  %v598_v4 = vadd.f32 %v597_v0, %v596_v62  ;;  %v609_v5 = vpop.f32.mrb[3].mxu1  ;;  %v441_v61 = vld [vmem:[%s834_s8] sm:$0x1] }
 0x10a   :  { %v387_v6 = vadd.f32 %v607_v1, %v521_v58  ;;  %v610_v7 = vadd.f32 %v609_v5, %v608_v2  ;;  %v457_v0 = vld [vmem:[%s835_s9] sm:$0x1] }
 0x10b   :  { %v374_v8 = vadd.f32 %v598_v4, %v521_v58  ;;  %v458_v10 = vmul.f32 %v371_v3, %v371_v3 }
 0x10c   :  { %v390_v9 = vadd.f32 %v610_v7, %v521_v58  ;;  %v462_v39 = vmul.f32 %v387_v6, %v387_v6 }
 0x10d   :  { %v557_v11 = vpack.c.bf16 %v374_v8, %v371_v3  ;;  %v442_v12 = vadd.f32 %v374_v8, %v371_v3  ;;  %v459_v13 = vmul.f32 %v374_v8, %v374_v8  ;;  %v599_v14 = vpop.f32.mrb[4].mxu0 }
 0x10e   :  { %v567_v15 = vpack.c.bf16 %v390_v9, %v387_v6  ;;  %v600_v16 = vpop.f32.mrb[5].mxu0  ;;  %v611_v17 = vpop.f32.mrb[4].mxu1  ;;  %v463_v42 = vmul.f32 %v390_v9, %v390_v9 }
 0x10f   :  { %558 = vst [vmem:[%s837_s7] sm:$0xff] %v557_v11   ;;  %v466_v18 = vadd.f32 %v459_v13, %v458_v10  ;;  %v601_v19 = vadd.f32 %v600_v16, %v599_v14  ;;  %v602_v20 = vpop.f32.mrb[6].mxu0  ;;  %v612_v21 = vpop.f32.mrb[5].mxu1 }
 0x110   :  { %575 = vst [vmem:[%s837_s7 + $0x10] sm:$0xff] %v567_v15   ;;  %v603_v22 = vpop.f32.mrb[7].mxu0  ;;  %v613_v23 = vadd.f32 %v612_v21, %v611_v17  ;;  %v614_v24 = vpop.f32.mrb[6].mxu1 }
 0x111   :  { %v379_v25 = vadd.f32 %v601_v19, %v521_v58  ;;  %v604_v26 = vadd.f32 %v603_v22, %v602_v20  ;;  %v615_v27 = vpop.f32.mrb[7].mxu1 }
 0x112   :  { %v395_v28 = vadd.f32 %v613_v23, %v521_v58  ;;  %v616_v29 = vadd.f32 %v615_v27, %v614_v24 }
 0x113   :  { %v443_v30 = vadd.f32 %v442_v12, %v379_v25  ;;  %v460_v31 = vmul.f32 %v379_v25, %v379_v25  ;;  %v382_v32 = vadd.f32 %v604_v26, %v521_v58 }
 0x114   :  { %v398_v33 = vadd.f32 %v616_v29, %v521_v58  ;;  %v464_v45 = vmul.f32 %v395_v28, %v395_v28 }
 0x115   :  { %v467_v34 = vadd.f32 %v466_v18, %v460_v31  ;;  %v562_v35 = vpack.c.bf16 %v382_v32, %v379_v25  ;;  %v444_v36 = vadd.f32 %v443_v30, %v382_v32  ;;  %v461_v37 = vmul.f32 %v382_v32, %v382_v32 }
 0x116   :  { %v572_v38 = vpack.c.bf16 %v398_v33, %v395_v28  ;;  %v465_v50 = vmul.f32 %v398_v33, %v398_v33 }
 0x117   :  { %574 = vst [vmem:[%s837_s7 + $0x8] sm:$0xff] %v562_v35   ;;  %v445_v40 = vadd.f32 %v444_v36, %v387_v6  ;;  %v468_v41 = vadd.f32 %v467_v34, %v461_v37 }
 0x118   :  { %576 = vst [vmem:[%s837_s7 + $0x18] sm:$0xff] %v572_v38  }
 0x119   :  { %v469_v43 = vadd.f32 %v468_v41, %v462_v39  ;;  %v446_v44 = vadd.f32 %v445_v40, %v390_v9 }
 0x11b   :  { %v447_v46 = vadd.f32 %v446_v44, %v395_v28  ;;  %v470_v47 = vadd.f32 %v469_v43, %v463_v42 }
 0x11d   :  { %v471_v48 = vadd.f32 %v470_v47, %v464_v45  ;;  %v448_v49 = vadd.f32 %v447_v46, %v398_v33 }
 0x11f   :  { %v449_v51 = vrot.slane %v448_v49, 4  ;;  %v472_v52 = vadd.f32 %v471_v48, %v465_v50 }
 0x121   :  { %v450_v54 = vadd.f32 %v449_v51, %v448_v49  ;;  %v473_v55 = vrot.slane %v472_v52, 4 }
 0x123   :  { %v451_v56 = vrot.slane %v450_v54, 2  ;;  %v474_v57 = vadd.f32 %v473_v55, %v472_v52 }
 0x125   :  { %v452_v53 = vadd.f32 %v451_v56, %v450_v54  ;;  %v475_v58 = vrot.slane %v474_v57, 2 }
 0x127   :  { %v453_v59 = vrot.slane %v452_v53, 1  ;;  %v476_v60 = vadd.f32 %v475_v58, %v474_v57 }
 0x129   :  { %v454_v62 = vadd.f32 %v453_v59, %v452_v53  ;;  %v477_v63 = vrot.slane %v476_v60, 1 }
 0x12b   :  { %v455_v1 = vadd.f32 %v454_v62, %v441_v61  ;;  %v478_v2 = vadd.f32 %v477_v63, %v476_v60 }
 0x12d   :  { %456 = vst [vmem:[%s834_s8] sm:$0x1] %v455_v1  ;;  %v479_v3 = vadd.f32 %v478_v2, %v457_v0 }
 0x12f   :  { %480 = vst [vmem:[%s835_s9] sm:$0x1] %v479_v3 }

// kernel: critic_forward.7
= control target key start
LH: loop header
LB: loop body
LE: loop exit
PB: predicated region body
PF: predicated region fallthrough
CT: control target
= control target key end

     0   :  { %vm186_vm0 = vcmask 7168   ;;  %s354_s1 = inlined_call_operand.vmem [shape: f32[1,1,128], index: 1, kind: input, shape index: {}]   ;;  %s355_s2 = inlined_call_operand.vmem [shape: f32[1,1,128], index: 2, kind: input, shape index: {}]   ;;  %s356_s6 = inlined_call_operand.<no memory space> [shape: f32[1,1], index: 6, kind: input, shape index: {}]   ;;  %s357_s3 = inlined_call_operand.vmem [shape: f32[1,128], index: 3, kind: input, shape index: {}]   ;;  %s358_s4 = inlined_call_operand.vmem [shape: f32[1,128], index: 4, kind: input, shape index: {}]   ;;  %s359_s0 = inlined_call_operand.vmem [shape: bf16[64,128], index: 0, kind: input, shape index: {}]   ;;  %s360_s5 = inlined_call_operand.vmem [shape: f32[1,128], index: 5, kind: input, shape index: {}]   ;;  %s361_s7 = inlined_call_operand.vmem [shape: f32[64,1], index: 7, kind: output, shape index: {}]  }
   0x1   :  { %v68_v0 = vld [vmem:[%s354_s1] sm:$0x1]  ;;  %v12_v2 = vstv %s356_s6  ;;  %v247_v14 = vld [vmem:[%s359_s0 + $0x8] sm:$0xff]   ;;  %v248_v17 = vld [vmem:[%s359_s0 + $0x10] sm:$0xff]  }
   0x2   :  { %v69_v1 = vld [vmem:[%s355_s2] sm:$0x1]  ;;  %v74_v3 = vmul.f32 0.015625, %v68_v0  ;;  %13 = vst [vmem:[#allocation4] sm:$0x1] %v12_v2  ;;  %v237_v18 = vunpack.c.l.bf16 %v247_v14  ;;  %v238_v20 = vunpack.c.h.bf16 %v247_v14  ;;  %v242_v22 = vunpack.c.h.bf16 %v248_v17  ;;  %v249_v24 = vld [vmem:[%s359_s0 + $0x18] sm:$0xff]  }
   0x3   :  { %v75_v4 = vmul.f32 0.015625, %v69_v1  ;;  %v70_v9 = vld [vmem:[%s357_s3] sm:$0x1]  ;;  %v241_v23 = vunpack.c.l.bf16 %v248_v17  ;;  %v246_v32 = vunpack.c.h.bf16 %v249_v24  ;;  %v245_v33 = vunpack.c.l.bf16 %v249_v24 }
   0x4   :  { %v76_v5 = vmul.f32 %v74_v3, %v74_v3  ;;  %v71_v12 = vld [vmem:[%s358_s4] sm:$0x1] }
   0x5   :  { %v232_v15 = vld [vmem:[%s359_s0] sm:$0xff]  }
   0x6   :  { %v77_v6 = vsub.f32 %v75_v4, %v76_v5  ;;  %v233_v19 = vunpack.c.l.bf16 %v232_v15  ;;  %v234_v21 = vunpack.c.h.bf16 %v232_v15  ;;  %v229_v39 = vld [vmem:[%s360_s5] ss:$0 sm:$0xff] }
   0x8   :  { %v78_v7 = vmax.f32 %v77_v6, 0.0 }
   0x9   :  { %v230_v62 = vld [vmem:[#allocation4] ss:$0 sm:$0xff] }
   0xa   :  { %v79_v8 = vadd.f32 1e-05, %v78_v7 }
   0xc   :  { %250 = vrsqrt.f32 %v79_v8 }
  0x16   :  { %v251_v10 = vpop.eup %250 }
  0x17   :  { %v81_v11 = vmul.f32 %v251_v10, %v70_v9 }
  0x19   :  { %v82_v13 = vmul.f32 %v81_v11, %v74_v3  ;;  %84 = vst [vmem:[#allocation2] sm:$0x1] %v81_v11 }
  0x1b   :  { %v83_v16 = vsub.f32 %v71_v12, %v82_v13 }
  0x1d   :  { %85 = vst [vmem:[#allocation3] sm:$0x1] %v83_v16 }
  0x20   :  { %v227_v25 = vld [vmem:[#allocation2] ss:$0 sm:$0xff] }
  0x21   :  { %v111_v26 = vmul.f32 %v237_v18, %v227_v25  ;;  %v109_v27 = vmul.f32 %v233_v19, %v227_v25  ;;  %v112_v28 = vmul.f32 %v238_v20, %v227_v25  ;;  %v110_v29 = vmul.f32 %v234_v21, %v227_v25 }
  0x22   :  { %v114_v30 = vmul.f32 %v242_v22, %v227_v25  ;;  %v113_v31 = vmul.f32 %v241_v23, %v227_v25  ;;  %v116_v42 = vmul.f32 %v246_v32, %v227_v25  ;;  %v115_v43 = vmul.f32 %v245_v33, %v227_v25 }
  0x24   :  { %v228_v34 = vld [vmem:[#allocation3] ss:$0 sm:$0xff] }
  0x25   :  { %v126_v35 = vadd.f32 %v228_v34, %v111_v26  ;;  %v124_v36 = vadd.f32 %v228_v34, %v109_v27  ;;  %v127_v37 = vadd.f32 %v228_v34, %v112_v28  ;;  %v125_v38 = vadd.f32 %v228_v34, %v110_v29 }
  0x26   :  { %v129_v40 = vadd.f32 %v228_v34, %v114_v30  ;;  %v128_v41 = vadd.f32 %v228_v34, %v113_v31  ;;  %v131_v50 = vadd.f32 %v228_v34, %v116_v42  ;;  %v130_v51 = vadd.f32 %v228_v34, %v115_v43 }
  0x27   :  { %v134_v44 = vmax.f32 %v126_v35, 0.0  ;;  %v132_v45 = vmax.f32 %v124_v36, 0.0  ;;  %v135_v46 = vmax.f32 %v127_v37, 0.0  ;;  %v133_v47 = vmax.f32 %v125_v38, 0.0 }
  0x28   :  { %v137_v54 = vmax.f32 %v129_v40, 0.0  ;;  %v136_v55 = vmax.f32 %v128_v41, 0.0  ;;  %v139_v58 = vmax.f32 %v131_v50, 0.0  ;;  %v138_v59 = vmax.f32 %v130_v51, 0.0 }
  0x29   :  { %v149_v48 = vmul.f32 %v229_v39, %v134_v44  ;;  %v147_v49 = vmul.f32 %v229_v39, %v132_v45  ;;  %v150_v52 = vmul.f32 %v229_v39, %v135_v46  ;;  %v148_v53 = vmul.f32 %v229_v39, %v133_v47 }
  0x2a   :  { %v152_v56 = vmul.f32 %v229_v39, %v137_v54  ;;  %v151_v57 = vmul.f32 %v229_v39, %v136_v55  ;;  %v154_v60 = vmul.f32 %v229_v39, %v139_v58  ;;  %v153_v61 = vmul.f32 %v229_v39, %v138_v59 }
  0x2b   :  { %159 = vadd.xlane.f32.xlu1 %v149_v48  ;;  %155 = vadd.xlane.f32.xlu0 %v147_v49 }
  0x2f   :  { %161 = vadd.xlane.f32.xlu1 %v150_v52  ;;  %157 = vadd.xlane.f32.xlu0 %v148_v53 }
  0x33   :  { %165 = vadd.xlane.f32.xlu1 %v152_v56  ;;  %163 = vadd.xlane.f32.xlu0 %v151_v57 }
  0x37   :  { %169 = vadd.xlane.f32.xlu1 %v154_v60  ;;  %167 = vadd.xlane.f32.xlu0 %v153_v61 }
  0xb8   :  { %v160_v63 = vpop.xlane.xlu1 %159  ;;  %v156_v0 = vpop.xlane.xlu0 %155 }
  0xb9   :  { %v180_v1 = vadd.f32 %v230_v62, %v160_v63  ;;  %v178_v2 = vadd.f32 %v230_v62, %v156_v0 }
  0xbb   :  { %189 = vst.msk [vmem:[%s361_s7 + $0x10] sm:$0xff] %vm186_vm0, %v180_v1  ;;  %187 = vst.msk [vmem:[%s361_s7] sm:$0xff] %vm186_vm0, %v178_v2 }
  0xbc   :  { %v162_v3 = vpop.xlane.xlu1 %161  ;;  %v158_v4 = vpop.xlane.xlu0 %157 }
  0xbd   :  { %v181_v5 = vadd.f32 %v230_v62, %v162_v3  ;;  %v179_v6 = vadd.f32 %v230_v62, %v158_v4 }
  0xbf   :  { %190 = vst.msk [vmem:[%s361_s7 + $0x18] sm:$0xff] %vm186_vm0, %v181_v5  ;;  %188 = vst.msk [vmem:[%s361_s7 + $0x8] sm:$0xff] %vm186_vm0, %v179_v6 }
  0xc0   :  { %v166_v7 = vpop.xlane.xlu1 %165  ;;  %v164_v8 = vpop.xlane.xlu0 %163 }
  0xc1   :  { %v183_v9 = vadd.f32 %v230_v62, %v166_v7  ;;  %v182_v10 = vadd.f32 %v230_v62, %v164_v8 }
  0xc3   :  { %192 = vst.msk [vmem:[%s361_s7 + $0x28] sm:$0xff] %vm186_vm0, %v183_v9  ;;  %191 = vst.msk [vmem:[%s361_s7 + $0x20] sm:$0xff] %vm186_vm0, %v182_v10 }
  0xc4   :  { %v170_v11 = vpop.xlane.xlu1 %169  ;;  %v168_v12 = vpop.xlane.xlu0 %167 }
  0xc5   :  { %v185_v13 = vadd.f32 %v230_v62, %v170_v11  ;;  %v184_v14 = vadd.f32 %v230_v62, %v168_v12 }
  0xc7   :  { %194 = vst.msk [vmem:[%s361_s7 + $0x38] sm:$0xff] %vm186_vm0, %v185_v13  ;;  %193 = vst.msk [vmem:[%s361_s7 + $0x30] sm:$0xff] %vm186_vm0, %v184_v14 }

// kernel: critic_forward.5
= control target key start
LH: loop header
LB: loop body
LE: loop exit
PB: predicated region body
PF: predicated region fallthrough
CT: control target
= control target key end

     0   :  { %v1520_v1 = vmov 0   ;;  %vm202_vm0 = vcmask 261120   ;;  %s2092_s1 = inlined_call_operand.vmem [shape: bf16[32,512], index: 1, kind: input, shape index: {}]   ;;  %s2093_s0 = inlined_call_operand.vmem [shape: bf16[64,32], index: 0, kind: input, shape index: {}]   ;;  %s2094_s7 = inlined_call_operand.vmem [shape: bf16[512,256], index: 7, kind: input, shape index: {}]   ;;  %s2095_s3 = inlined_call_operand.vmem [shape: f32[1,1,512], index: 3, kind: input, shape index: {}]   ;;  %s2096_s4 = inlined_call_operand.vmem [shape: f32[1,1,512], index: 4, kind: input, shape index: {}]   ;;  %s2097_s5 = inlined_call_operand.vmem [shape: f32[1,512], index: 5, kind: input, shape index: {}]   ;;  %s2098_s6 = inlined_call_operand.vmem [shape: f32[1,512], index: 6, kind: input, shape index: {}]   ;;  %s2099_s2 = inlined_call_operand.vmem [shape: f32[1,512], index: 2, kind: input, shape index: {}]   ;;  %s2100_s10 = inlined_call_operand.vmem [shape: f32[1,1,256], index: 10, kind: output, shape index: {1}]   ;;  %s2101_s11 = inlined_call_operand.vmem [shape: f32[1,1,256], index: 11, kind: output, shape index: {2}]   ;;  %s2102_s8 = inlined_call_operand.vmem [shape: f32[1,256], index: 8, kind: input, shape index: {}]   ;;  %s2103_s9 = inlined_call_operand.vmem [shape: bf16[64,256], index: 9, kind: output, shape index: {0}]  }
   0x1   :  { %v1406_v0 = vld [vmem:[%s2092_s1 + $0x4] ss:$16 sps:$4 sm:$0xff]   ;;  %247 = vmatprep.mubr.bf16.mxu0 %v1520_v1  ;;  %320 = vmatprep.mubr.bf16.mxu1 %v1520_v1  ;;  %v1408_v2 = vld [vmem:[%s2092_s1 + $0xc] ss:$16 sps:$4 sm:$0xff]   ;;  %v1410_v3 = vld [vmem:[%s2092_s1] ss:$16 sps:$4 sm:$0xff]  }
   0x2   :  { %215 = vmatprep.subr.bf16.mxu0 %v1406_v0  ;;  %v1411_v4 = vld [vmem:[%s2092_s1 + $0x8] ss:$16 sps:$4 sm:$0xff]   ;;  %288 = vmatprep.subr.bf16.mxu1 %v1408_v2  ;;  %v1412_v5 = vld [vmem:[%s2092_s1 + $0x24] ss:$16 sps:$4 sm:$0xff]   ;;  %v1414_v6 = vld [vmem:[%s2092_s1 + $0x2c] ss:$16 sps:$4 sm:$0xff]  }
   0x3   :  { %216 = vmatpush1.bf16.msra.mxu0 %v1410_v3  ;;  %289 = vmatpush1.bf16.msra.mxu1 %v1411_v4  ;;  %v1416_v7 = vld [vmem:[%s2092_s1 + $0x20] ss:$16 sps:$4 sm:$0xff]   ;;  %v1417_v8 = vld [vmem:[%s2092_s1 + $0x28] ss:$16 sps:$4 sm:$0xff]   ;;  %v1424_v11 = vld [vmem:[%s2094_s7 + $0x4] ss:$8 sps:$4 sm:$0xff]  }
   0x4   :  { %217 = vmatprep.subr.bf16.mxu0 %v1412_v5  ;;  %290 = vmatprep.subr.bf16.mxu1 %v1414_v6  ;;  %v1418_v9 = vld [vmem:[%s2093_s0] sm:$0xff]   ;;  %v1428_v14 = vld [vmem:[%s2094_s7 + $0x10] ss:$8 sps:$4 sm:$0xff]   ;;  %v1430_v15 = vld [vmem:[%s2094_s7 + $0x14] ss:$8 sps:$4 sm:$0xff]  }
   0x5   :  { %v1422_v10 = vld [vmem:[%s2094_s7] ss:$8 sps:$4 sm:$0xff]   ;;  %v1427_v13 = vld [vmem:[%s2094_s7 + $0x104] ss:$8 sps:$4 sm:$0xff]   ;;  %v1431_v16 = vld [vmem:[%s2094_s7 + $0x110] ss:$8 sps:$4 sm:$0xff]  }
   0x6   :  { %v1425_v12 = vld [vmem:[%s2094_s7 + $0x100] ss:$8 sps:$4 sm:$0xff]   ;;  %v1433_v17 = vld [vmem:[%s2094_s7 + $0x114] ss:$8 sps:$4 sm:$0xff]   ;;  %v1436_v19 = vld [vmem:[%s2094_s7 + $0x24] ss:$8 sps:$4 sm:$0xff]  }
   0x7   :  { %218 = vmatpush1.bf16.msra.mxu0 %v1416_v7  ;;  %291 = vmatpush1.bf16.msra.mxu1 %v1417_v8  ;;  %v1419_v18 = vld [vmem:[%s2093_s0 + $0x8] sm:$0xff]   ;;  %v1442_v23 = vld [vmem:[%s2094_s7 + $0x34] ss:$8 sps:$4 sm:$0xff]   ;;  %v1440_v25 = vld [vmem:[%s2094_s7 + $0x30] ss:$8 sps:$4 sm:$0xff]  }
   0x8   :  { %913 = vmatprep.subr.bf16.mxu1 %v1424_v11  ;;  %986 = vmatprep.subr.bf16.mxu0 %v1427_v13  ;;  %v1439_v20 = vld [vmem:[%s2094_s7 + $0x124] ss:$8 sps:$4 sm:$0xff]   ;;  %v1434_v21 = vld [vmem:[%s2094_s7 + $0x20] ss:$8 sps:$4 sm:$0xff]   ;;  %v1445_v24 = vld [vmem:[%s2094_s7 + $0x134] ss:$8 sps:$4 sm:$0xff]  }
   0x9   :  { %v1437_v22 = vld [vmem:[%s2094_s7 + $0x120] ss:$8 sps:$4 sm:$0xff]   ;;  %v1443_v26 = vld [vmem:[%s2094_s7 + $0x130] ss:$8 sps:$4 sm:$0xff]   ;;  %v1448_v28 = vld [vmem:[%s2094_s7 + $0x44] ss:$8 sps:$4 sm:$0xff]  }
   0xa   :  { %1283 = vmatmul.mubr.msk.bf16.vlgmr.msra.gmra.mrb[0].mxu0 %vm202_vm0, %v1418_v9  ;;  %1287 = vmatmul.mubr.msk.bf16.vlgmr.msra.gmra.mrb[0].mxu1 %vm202_vm0, %v1418_v9  ;;  %v1420_v27 = vld [vmem:[%s2093_s0 + $0x10] sm:$0xff]   ;;  %v1451_v29 = vld [vmem:[%s2094_s7 + $0x144] ss:$8 sps:$4 sm:$0xff]   ;;  %v1446_v30 = vld [vmem:[%s2094_s7 + $0x40] ss:$8 sps:$4 sm:$0xff]   ;;  %v94_v9 = vlaneseq }
   0xb   :  { %257 = vmatprep.mubr.bf16.mxu0 %v1520_v1  ;;  %330 = vmatprep.mubr.bf16.mxu1 %v1520_v1  ;;  %v1449_v31 = vld [vmem:[%s2094_s7 + $0x140] ss:$8 sps:$4 sm:$0xff]   ;;  %v1454_v32 = vld [vmem:[%s2094_s7 + $0x54] ss:$8 sps:$4 sm:$0xff]   ;;  %v1452_v34 = vld [vmem:[%s2094_s7 + $0x50] ss:$8 sps:$4 sm:$0xff]  }
   0xc   :  { %914 = vmatpush1.bf16.msra.mxu1 %v1422_v10  ;;  %987 = vmatpush1.bf16.msra.mxu0 %v1425_v12  ;;  %v1457_v33 = vld [vmem:[%s2094_s7 + $0x154] ss:$8 sps:$4 sm:$0xff]   ;;  %v1455_v35 = vld [vmem:[%s2094_s7 + $0x150] ss:$8 sps:$4 sm:$0xff]   ;;  %v1460_v37 = vld [vmem:[%s2094_s7 + $0x64] ss:$8 sps:$4 sm:$0xff]  }
   0xd   :  { %915 = vmatprep.subr.bf16.mxu1 %v1430_v15  ;;  %988 = vmatprep.subr.bf16.mxu0 %v1433_v17  ;;  %v1421_v36 = vld [vmem:[%s2093_s0 + $0x18] sm:$0xff]   ;;  %v1463_v38 = vld [vmem:[%s2094_s7 + $0x164] ss:$8 sps:$4 sm:$0xff]   ;;  %v1458_v39 = vld [vmem:[%s2094_s7 + $0x60] ss:$8 sps:$4 sm:$0xff]   ;;  %vm96_vm1 = vcmp.lt.s32.totalorder %v94_v9, 512 }
   0xe   :  { %v1461_v40 = vld [vmem:[%s2094_s7 + $0x160] ss:$8 sps:$4 sm:$0xff]   ;;  %v1466_v41 = vld [vmem:[%s2094_s7 + $0x74] ss:$8 sps:$4 sm:$0xff]   ;;  %v1464_v43 = vld [vmem:[%s2094_s7 + $0x70] ss:$8 sps:$4 sm:$0xff]  }
   0xf   :  { %v1469_v42 = vld [vmem:[%s2094_s7 + $0x174] ss:$8 sps:$4 sm:$0xff]   ;;  %v1467_v44 = vld [vmem:[%s2094_s7 + $0x170] ss:$8 sps:$4 sm:$0xff]   ;;  %v1472_v45 = vld [vmem:[%s2094_s7 + $0x84] ss:$8 sps:$4 sm:$0xff]  }
  0x10   :  { %916 = vmatpush1.bf16.msra.mxu1 %v1428_v14  ;;  %989 = vmatpush1.bf16.msra.mxu0 %v1431_v16  ;;  %v1475_v46 = vld [vmem:[%s2094_s7 + $0x184] ss:$8 sps:$4 sm:$0xff]   ;;  %v1470_v47 = vld [vmem:[%s2094_s7 + $0x80] ss:$8 sps:$4 sm:$0xff]   ;;  %v1478_v49 = vld [vmem:[%s2094_s7 + $0x94] ss:$8 sps:$4 sm:$0xff]  }
  0x11   :  { %917 = vmatprep.subr.bf16.mxu1 %v1436_v19  ;;  %990 = vmatprep.subr.bf16.mxu0 %v1439_v20  ;;  %v1473_v48 = vld [vmem:[%s2094_s7 + $0x180] ss:$8 sps:$4 sm:$0xff]   ;;  %v1481_v50 = vld [vmem:[%s2094_s7 + $0x194] ss:$8 sps:$4 sm:$0xff]   ;;  %v1476_v51 = vld [vmem:[%s2094_s7 + $0x90] ss:$8 sps:$4 sm:$0xff]  }
  0x12   :  { %1284 = vmatmul.mubr.msk.bf16.gmra.mrb[4].mxu0 %vm202_vm0, %v1419_v18  ;;  %1288 = vmatmul.mubr.msk.bf16.gmra.mrb[4].mxu1 %vm202_vm0, %v1419_v18  ;;  %v1479_v52 = vld [vmem:[%s2094_s7 + $0x190] ss:$8 sps:$4 sm:$0xff]   ;;  %v78_v53 = vld [vmem:[%s2095_s3] sm:$0xf]  ;;  %v1484_v55 = vld [vmem:[%s2094_s7 + $0xa4] ss:$8 sps:$4 sm:$0xff]  }
  0x13   :  { %267 = vmatprep.mubr.bf16.mxu0 %v1520_v1  ;;  %340 = vmatprep.mubr.bf16.mxu1 %v1520_v1  ;;  %v79_v54 = vld [vmem:[%s2096_s4] sm:$0xf]  ;;  %v1487_v56 = vld [vmem:[%s2094_s7 + $0x1a4] ss:$8 sps:$4 sm:$0xff]   ;;  %v84_v57 = vmul.f32 0.015625, %v78_v53  ;;  %vm2012_vm2 = vcmp.lt.s32.totalorder %v94_v9, 256 }
  0x14   :  { %918 = vmatpush1.bf16.msra.mxu1 %v1434_v21  ;;  %991 = vmatpush1.bf16.msra.mxu0 %v1437_v22  ;;  %v85_v58 = vmul.f32 0.015625, %v79_v54  ;;  %v1482_v61 = vld [vmem:[%s2094_s7 + $0xa0] ss:$8 sps:$4 sm:$0xff]   ;;  %v1490_v63 = vld [vmem:[%s2094_s7 + $0xb4] ss:$8 sps:$4 sm:$0xff]  }
  0x15   :  { %919 = vmatprep.subr.bf16.mxu1 %v1442_v23  ;;  %992 = vmatprep.subr.bf16.mxu0 %v1445_v24  ;;  %v86_v59 = vmul.f32 %v84_v57, %v84_v57  ;;  %v1485_v62 = vld [vmem:[%s2094_s7 + $0x1a0] ss:$8 sps:$4 sm:$0xff]   ;;  %v1493_v0 = vld [vmem:[%s2094_s7 + $0x1b4] ss:$8 sps:$4 sm:$0xff]   ;;  %v1488_v3 = vld [vmem:[%s2094_s7 + $0xb0] ss:$8 sps:$4 sm:$0xff]  }
  0x16   :  { %v1491_v4 = vld [vmem:[%s2094_s7 + $0x1b0] ss:$8 sps:$4 sm:$0xff]   ;;  %v1496_v5 = vld [vmem:[%s2094_s7 + $0xc4] ss:$8 sps:$4 sm:$0xff]   ;;  %v1494_v7 = vld [vmem:[%s2094_s7 + $0xc0] ss:$8 sps:$4 sm:$0xff]  }
  0x17   :  { %v87_v60 = vsub.f32 %v85_v58, %v86_v59  ;;  %v1499_v6 = vld [vmem:[%s2094_s7 + $0x1c4] ss:$8 sps:$4 sm:$0xff]   ;;  %v1497_v8 = vld [vmem:[%s2094_s7 + $0x1c0] ss:$8 sps:$4 sm:$0xff]   ;;  %v1502_v16 = vld [vmem:[%s2094_s7 + $0xd4] ss:$8 sps:$4 sm:$0xff]  }
  0x18   :  { %920 = vmatpush1.bf16.msra.mxu1 %v1440_v25  ;;  %993 = vmatpush1.bf16.msra.mxu0 %v1443_v26  ;;  %v80_v10 = vld [vmem:[%s2097_s5] sm:$0xf]  ;;  %v1505_v17 = vld [vmem:[%s2094_s7 + $0x1d4] ss:$8 sps:$4 sm:$0xff]   ;;  %v1500_v18 = vld [vmem:[%s2094_s7 + $0xd0] ss:$8 sps:$4 sm:$0xff]  }
  0x19   :  { %921 = vmatprep.subr.bf16.mxu1 %v1448_v28  ;;  %994 = vmatprep.subr.bf16.mxu0 %v1451_v29  ;;  %v81_v13 = vld [vmem:[%s2098_s6] sm:$0xf]  ;;  %v1503_v19 = vld [vmem:[%s2094_s7 + $0x1d0] ss:$8 sps:$4 sm:$0xff]   ;;  %v1508_v20 = vld [vmem:[%s2094_s7 + $0xe4] ss:$8 sps:$4 sm:$0xff]  }
  0x1a   :  { %1285 = vmatmul.mubr.msk.bf16.gmra.mrb[8].mxu0 %vm202_vm0, %v1420_v27  ;;  %1289 = vmatmul.mubr.msk.bf16.gmra.mrb[8].mxu1 %vm202_vm0, %v1420_v27  ;;  %v1511_v21 = vld [vmem:[%s2094_s7 + $0x1e4] ss:$8 sps:$4 sm:$0xff]   ;;  %v1506_v22 = vld [vmem:[%s2094_s7 + $0xe0] ss:$8 sps:$4 sm:$0xff]   ;;  %v1514_v24 = vld [vmem:[%s2094_s7 + $0xf4] ss:$8 sps:$4 sm:$0xff]  }
  0x1b   :  { %277 = vmatprep.mubr.bf16.mxu0 %v1520_v1  ;;  %350 = vmatprep.mubr.bf16.mxu1 %v1520_v1  ;;  %v88_v1 = vmax.f32 %v87_v60, 0.0  ;;  %v1509_v23 = vld [vmem:[%s2094_s7 + $0x1e0] ss:$8 sps:$4 sm:$0xff]   ;;  %v1517_v25 = vld [vmem:[%s2094_s7 + $0x1f4] ss:$8 sps:$4 sm:$0xff]   ;;  %v1841_v28 = vshrl.u32 %v94_v9, 7 }
  0x1c   :  { %922 = vmatpush1.bf16.msra.mxu1 %v1446_v30  ;;  %995 = vmatpush1.bf16.msra.mxu0 %v1449_v31  ;;  %v1512_v26 = vld [vmem:[%s2094_s7 + $0xf0] ss:$8 sps:$4 sm:$0xff]   ;;  %v120_v31 = vld [vmem:[%s2099_s2] sm:$0xf] }
  0x1d   :  { %923 = vmatprep.subr.bf16.mxu1 %v1454_v32  ;;  %996 = vmatprep.subr.bf16.mxu0 %v1457_v33  ;;  %v89_v2 = vadd.f32 1e-05, %v88_v1  ;;  %v1515_v27 = vld [vmem:[%s2094_s7 + $0x1f0] ss:$8 sps:$4 sm:$0xff]   ;;  %v1844_v29 = vsub.s32 0, %v1841_v28  ;;  %v132_v30 = vsub.s32 2, %v1841_v28 }
  0x1e   :  { %v1851_v32 = vsub.s32 1, %v1841_v28  ;;  %v136_v33 = vsub.s32 3, %v1841_v28  ;;  %v581_v9 = vld [vmem:[%s2102_s8] sm:$0x3] }
  0x1f   :  { %1518 = vrsqrt.f32 %v89_v2 }
  0x20   :  { %924 = vmatpush1.bf16.msra.mxu1 %v1452_v34  ;;  %997 = vmatpush1.bf16.msra.mxu0 %v1455_v35  ;;  %v1855_v35 = vrot.slane %v120_v31, %v1844_v29 }
  0x21   :  { %925 = vmatprep.subr.bf16.mxu1 %v1460_v37  ;;  %998 = vmatprep.subr.bf16.mxu0 %v1463_v38  ;;  %v1860_v38 = vrot.slane %v120_v31, %v1851_v32 }
  0x22   :  { %1286 = vmatmul.mubr.msk.bf16.gmra.mrb[12].mxu0 %vm202_vm0, %v1421_v36  ;;  %1290 = vmatmul.mubr.msk.bf16.gmra.mrb[12].mxu1 %vm202_vm0, %v1421_v36  ;;  %v1857_v36 = vrot.slane %v120_v31, %v132_v30 }
  0x24   :  { %926 = vmatpush1.bf16.msra.mxu1 %v1458_v39  ;;  %999 = vmatpush1.bf16.msra.mxu0 %v1461_v40  ;;  %v1862_v39 = vrot.slane %v120_v31, %v136_v33 }
  0x25   :  { %927 = vmatprep.subr.bf16.mxu1 %v1466_v41  ;;  %1000 = vmatprep.subr.bf16.mxu0 %v1469_v42 }
  0x28   :  { %928 = vmatpush1.bf16.msra.mxu1 %v1464_v43  ;;  %1001 = vmatpush1.bf16.msra.mxu0 %v1467_v44 }
  0x29   :  { %929 = vmatprep.subr.bf16.mxu1 %v1472_v45  ;;  %1002 = vmatprep.subr.bf16.mxu0 %v1475_v46  ;;  %v1519_v11 = vpop.eup %1518 }
  0x2a   :  { %v91_v12 = vmul.f32 %v1519_v11, %v80_v10 }
  0x2c   :  { %930 = vmatpush1.bf16.msra.mxu1 %v1470_v47  ;;  %1003 = vmatpush1.bf16.msra.mxu0 %v1473_v48  ;;  %v92_v14 = vmul.f32 %v91_v12, %v84_v57  ;;  %98 = vst.msk [vmem:[#allocation2] sm:$0xf] %vm96_vm1, %v91_v12 }
  0x2d   :  { %931 = vmatprep.subr.bf16.mxu1 %v1478_v49  ;;  %1004 = vmatprep.subr.bf16.mxu0 %v1481_v50 }
  0x2e   :  { %v93_v15 = vsub.f32 %v81_v13, %v92_v14 }
  0x30   :  { %932 = vmatpush1.bf16.msra.mxu1 %v1476_v51  ;;  %1005 = vmatpush1.bf16.msra.mxu0 %v1479_v52  ;;  %99 = vst.msk [vmem:[#allocation3] sm:$0xf] %vm96_vm1, %v93_v15 }
  0x31   :  { %933 = vmatprep.subr.bf16.mxu1 %v1484_v55  ;;  %1006 = vmatprep.subr.bf16.mxu0 %v1487_v56 }
  0x33   :  { %v361_v34 = vld [vmem:[#allocation2] sm:$0xf] }
  0x34   :  { %934 = vmatpush1.bf16.msra.mxu1 %v1482_v61  ;;  %1007 = vmatpush1.bf16.msra.mxu0 %v1485_v62  ;;  %v1865_v40 = vrot.slane %v361_v34, %v1844_v29  ;;  %v1867_v41 = vrot.slane %v361_v34, %v132_v30  ;;  %v1870_v44 = vrot.slane %v361_v34, %v1851_v32 }
  0x35   :  { %935 = vmatprep.subr.bf16.mxu1 %v1490_v63  ;;  %1008 = vmatprep.subr.bf16.mxu0 %v1493_v0  ;;  %v1872_v45 = vrot.slane %v361_v34, %v136_v33 }
  0x37   :  { %v415_v37 = vld [vmem:[#allocation3] sm:$0xf] }
  0x38   :  { %936 = vmatpush1.bf16.msra.mxu1 %v1488_v3  ;;  %1009 = vmatpush1.bf16.msra.mxu0 %v1491_v4  ;;  %v1876_v47 = vrot.slane %v415_v37, %v1844_v29  ;;  %v1879_v49 = vrot.slane %v415_v37, %v132_v30  ;;  %v1883_v53 = vrot.slane %v415_v37, %v1851_v32 }
  0x39   :  { %937 = vmatprep.subr.bf16.mxu1 %v1496_v5  ;;  %1010 = vmatprep.subr.bf16.mxu0 %v1499_v6  ;;  %v1886_v55 = vrot.slane %v415_v37, %v136_v33 }
  0x3c   :  { %938 = vmatpush1.bf16.msra.mxu1 %v1494_v7  ;;  %1011 = vmatpush1.bf16.msra.mxu0 %v1497_v8 }
  0x3d   :  { %939 = vmatprep.subr.bf16.mxu1 %v1502_v16  ;;  %1012 = vmatprep.subr.bf16.mxu0 %v1505_v17 }
  0x40   :  { %940 = vmatpush1.bf16.msra.mxu1 %v1500_v18  ;;  %1013 = vmatpush1.bf16.msra.mxu0 %v1503_v19 }
  0x41   :  { %941 = vmatprep.subr.bf16.mxu1 %v1508_v20  ;;  %1014 = vmatprep.subr.bf16.mxu0 %v1511_v21 }
  0x44   :  { %942 = vmatpush1.bf16.msra.mxu1 %v1506_v22  ;;  %1015 = vmatpush1.bf16.msra.mxu0 %v1509_v23 }
  0x45   :  { %943 = vmatprep.subr.bf16.mxu1 %v1514_v24  ;;  %1016 = vmatprep.subr.bf16.mxu0 %v1517_v25 }
  0x48   :  { %944 = vmatpush1.bf16.msra.mxu1 %v1512_v26  ;;  %1017 = vmatpush1.bf16.msra.mxu0 %v1515_v27 }
  0xdd   :  { %v249_v42 = vpop.f32.mrb[0].mxu0  ;;  %v322_v43 = vpop.f32.mrb[0].mxu1 }
  0xde   :  { %v250_v46 = vadd.f32 %v249_v42, %v1855_v35  ;;  %v323_v48 = vadd.f32 %v322_v43, %v1857_v36  ;;  %v251_v50 = vpop.f32.mrb[1].mxu0  ;;  %v324_v51 = vpop.f32.mrb[1].mxu1 }
  0xdf   :  { %v252_v52 = vadd.f32 %v251_v50, %v1860_v38  ;;  %v325_v54 = vadd.f32 %v324_v51, %v1862_v39  ;;  %v253_v56 = vpop.f32.mrb[2].mxu0  ;;  %v326_v57 = vpop.f32.mrb[2].mxu1 }
  0xe0   :  { %v383_v58 = vmul.f32 %v1865_v40, %v250_v46  ;;  %v385_v59 = vmul.f32 %v1867_v41, %v323_v48  ;;  %v254_v60 = vadd.f32 %v253_v56, %v1855_v35  ;;  %v327_v61 = vadd.f32 %v326_v57, %v1857_v36  ;;  %v255_v62 = vpop.f32.mrb[3].mxu0  ;;  %v328_v63 = vpop.f32.mrb[3].mxu1 }
  0xe1   :  { %v384_v0 = vmul.f32 %v1870_v44, %v252_v52  ;;  %v386_v1 = vmul.f32 %v1872_v45, %v325_v54  ;;  %v256_v2 = vadd.f32 %v255_v62, %v1860_v38  ;;  %v329_v3 = vadd.f32 %v328_v63, %v1862_v39 }
  0xe2   :  { %v437_v4 = vadd.f32 %v1876_v47, %v383_v58  ;;  %v439_v5 = vadd.f32 %v1879_v49, %v385_v59  ;;  %v387_v6 = vmul.f32 %v1865_v40, %v254_v60  ;;  %v389_v7 = vmul.f32 %v1867_v41, %v327_v61 }
  0xe3   :  { %v440_v8 = vadd.f32 %v1886_v55, %v386_v1  ;;  %v388_v10 = vmul.f32 %v1870_v44, %v256_v2  ;;  %v390_v11 = vmul.f32 %v1872_v45, %v329_v3  ;;  %v438_v13 = vadd.f32 %v1883_v53, %v384_v0 }
  0xe4   :  { %v471_v12 = vmax.f32 %v439_v5, 0.0  ;;  %v441_v14 = vadd.f32 %v1876_v47, %v387_v6  ;;  %v443_v15 = vadd.f32 %v1879_v49, %v389_v7  ;;  %v469_v16 = vmax.f32 %v437_v4, 0.0 }
  0xe5   :  { %v472_v17 = vmax.f32 %v440_v8, 0.0  ;;  %v442_v18 = vadd.f32 %v1883_v53, %v388_v10  ;;  %v444_v19 = vadd.f32 %v1886_v55, %v390_v11  ;;  %v259_v20 = vpop.f32.mrb[4].mxu0  ;;  %v332_v21 = vpop.f32.mrb[4].mxu1  ;;  %v470_v2 = vmax.f32 %v438_v13, 0.0 }
  0xe6   :  { %v473_v22 = vmax.f32 %v441_v14, 0.0  ;;  %v475_v23 = vmax.f32 %v443_v15, 0.0  ;;  %v260_v24 = vadd.f32 %v259_v20, %v1855_v35  ;;  %v333_v25 = vadd.f32 %v332_v21, %v1857_v36  ;;  %v261_v26 = vpop.f32.mrb[5].mxu0  ;;  %v334_v27 = vpop.f32.mrb[5].mxu1 }
  0xe7   :  { %v474_v30 = vmax.f32 %v442_v18, 0.0  ;;  %v476_v31 = vmax.f32 %v444_v19, 0.0  ;;  %v262_v33 = vadd.f32 %v261_v26, %v1860_v38  ;;  %v335_v34 = vadd.f32 %v334_v27, %v1862_v39  ;;  %v263_v37 = vpop.f32.mrb[6].mxu0  ;;  %v336_v42 = vpop.f32.mrb[6].mxu1 }
  0xe8   :  { %v501_v43 = vpack.c.bf16 %v473_v22, %v469_v16  ;;  %v503_v46 = vpack.c.bf16 %v475_v23, %v471_v12  ;;  %v391_v48 = vmul.f32 %v1865_v40, %v260_v24  ;;  %v393_v50 = vmul.f32 %v1867_v41, %v333_v25  ;;  %v265_v51 = vpop.f32.mrb[7].mxu0  ;;  %v338_v52 = vpop.f32.mrb[7].mxu1 }
  0xe9   :  { %v392_v54 = vmul.f32 %v1870_v44, %v262_v33  ;;  %v394_v56 = vmul.f32 %v1872_v45, %v335_v34  ;;  %v264_v57 = vadd.f32 %v263_v37, %v1855_v35  ;;  %v337_v58 = vadd.f32 %v336_v42, %v1857_v36 }
  0xea   :  { %v1919_v59 = vadd.f32 %v1876_v47, %v391_v48  ;;  %v1922_v60 = vadd.f32 %v1879_v49, %v393_v50  ;;  %v266_v61 = vadd.f32 %v265_v51, %v1860_v38  ;;  %v339_v62 = vadd.f32 %v338_v52, %v1862_v39 }
  0xeb   :  { %v1927_v63 = vadd.f32 %v1886_v55, %v394_v56  ;;  %v395_v0 = vmul.f32 %v1865_v40, %v264_v57  ;;  %v397_v1 = vmul.f32 %v1867_v41, %v337_v58  ;;  %v446_v3 = vadd.f32 %v1883_v53, %v392_v54 }
  0xec   :  { %v396_v4 = vmul.f32 %v1870_v44, %v266_v61  ;;  %v398_v5 = vmul.f32 %v1872_v45, %v339_v62  ;;  %v477_v6 = vmax.f32 %v1919_v59, 0.0  ;;  %v479_v7 = vmax.f32 %v1922_v60, 0.0 }
  0xed   :  { %v1937_v8 = vadd.f32 %v1876_v47, %v395_v0  ;;  %v1940_v10 = vadd.f32 %v1879_v49, %v397_v1  ;;  %v269_v11 = vpop.f32.mrb[8].mxu0  ;;  %v342_v12 = vpop.f32.mrb[8].mxu1  ;;  %v502_v15 = vpack.c.bf16 %v474_v30, %v470_v2  ;;  %v504_v16 = vpack.c.bf16 %v476_v31, %v472_v17 }
  0xee   :  { %v450_v13 = vadd.f32 %v1883_v53, %v396_v4  ;;  %v452_v14 = vadd.f32 %v1886_v55, %v398_v5  ;;  %v271_v18 = vpop.f32.mrb[9].mxu0  ;;  %v344_v19 = vpop.f32.mrb[9].mxu1  ;;  %v480_v20 = vmax.f32 %v1927_v63, 0.0  ;;  %v270_v22 = vadd.f32 %v269_v11, %v1855_v35 }
  0xef   :  { %v481_v21 = vmax.f32 %v1937_v8, 0.0  ;;  %v343_v23 = vadd.f32 %v342_v12, %v1857_v36  ;;  %v273_v24 = vpop.f32.mrb[10].mxu0  ;;  %v346_v25 = vpop.f32.mrb[10].mxu1  ;;  %v483_v26 = vmax.f32 %v1940_v10, 0.0  ;;  %945 = vmatprep.mubr.bf16.mxu1 %v502_v15  ;;  %1018 = vmatprep.mubr.bf16.mxu0 %v504_v16  ;;  %v272_v30 = vadd.f32 %v271_v18, %v1860_v38 }
  0xf0   :  { %v482_v27 = vmax.f32 %v450_v13, 0.0  ;;  %v345_v17 = vadd.f32 %v344_v19, %v1862_v39  ;;  %v275_v31 = vpop.f32.mrb[11].mxu0  ;;  %v348_v33 = vpop.f32.mrb[11].mxu1  ;;  %v484_v34 = vmax.f32 %v452_v14, 0.0  ;;  %946 = vmatmul.mubr.bf16.vlgmr.msra.gmra.mrb[16].mxu1 %v501_v43  ;;  %1019 = vmatmul.mubr.bf16.vlgmr.msra.gmra.mrb[16].mxu0 %v503_v46  ;;  %v399_v37 = vmul.f32 %v1865_v40, %v270_v22 }
  0xf1   :  { %v401_v42 = vmul.f32 %v1867_v41, %v343_v23  ;;  %v274_v48 = vadd.f32 %v273_v24, %v1855_v35  ;;  %v400_v50 = vmul.f32 %v1870_v44, %v272_v30  ;;  %v347_v52 = vadd.f32 %v346_v25, %v1857_v36 }
  0xf2   :  { %v402_v51 = vmul.f32 %v1872_v45, %v345_v17  ;;  %v276_v54 = vadd.f32 %v275_v31, %v1860_v38  ;;  %v1959_v56 = vadd.f32 %v1876_v47, %v399_v37  ;;  %v349_v57 = vadd.f32 %v348_v33, %v1862_v39 }
  0xf3   :  { %v1962_v43 = vadd.f32 %v1879_v49, %v401_v42  ;;  %v403_v46 = vmul.f32 %v1865_v40, %v274_v48  ;;  %v1967_v58 = vadd.f32 %v1883_v53, %v400_v50  ;;  %v405_v62 = vmul.f32 %v1867_v41, %v347_v52 }
  0xf4   :  { %v1970_v61 = vadd.f32 %v1886_v55, %v402_v51  ;;  %v404_v63 = vmul.f32 %v1870_v44, %v276_v54  ;;  %v478_v0 = vmax.f32 %v446_v3, 0.0  ;;  %v485_v1 = vmax.f32 %v1959_v56, 0.0 }
  0xf5   :  { %v457_v2 = vadd.f32 %v1876_v47, %v403_v46  ;;  %v406_v4 = vmul.f32 %v1872_v45, %v349_v57  ;;  %v279_v5 = vpop.f32.mrb[12].mxu0  ;;  %v352_v8 = vpop.f32.mrb[12].mxu1  ;;  %v487_v10 = vmax.f32 %v1962_v43, 0.0  ;;  %v486_v11 = vmax.f32 %v1967_v58, 0.0 }
  0xf6   :  { %v459_v12 = vadd.f32 %v1879_v49, %v405_v62  ;;  %v458_v13 = vadd.f32 %v1883_v53, %v404_v63  ;;  %v281_v14 = vpop.f32.mrb[13].mxu0  ;;  %v354_v15 = vpop.f32.mrb[13].mxu1  ;;  %v488_v3 = vmax.f32 %v1970_v61, 0.0  ;;  %v506_v18 = vpack.c.bf16 %v482_v27, %v478_v0 }
  0xf7   :  { %v460_v16 = vadd.f32 %v1886_v55, %v406_v4  ;;  %v508_v19 = vpack.c.bf16 %v484_v34, %v480_v20  ;;  %v283_v22 = vpop.f32.mrb[14].mxu0  ;;  %v356_v23 = vpop.f32.mrb[14].mxu1  ;;  %v489_v24 = vmax.f32 %v457_v2, 0.0  ;;  %v505_v30 = vpack.c.bf16 %v481_v21, %v477_v6 }
  0xf8   :  { %v491_v25 = vmax.f32 %v459_v12, 0.0  ;;  %v507_v17 = vpack.c.bf16 %v483_v26, %v479_v7  ;;  %v285_v31 = vpop.f32.mrb[15].mxu0  ;;  %v358_v33 = vpop.f32.mrb[15].mxu1  ;;  %v490_v37 = vmax.f32 %v458_v13, 0.0  ;;  %955 = vmatprep.mubr.bf16.mxu1 %v506_v18  ;;  %v280_v42 = vadd.f32 %v279_v5, %v1855_v35 }
  0xf9   :  { %1028 = vmatprep.mubr.bf16.mxu0 %v508_v19  ;;  %v353_v27 = vadd.f32 %v352_v8, %v1857_v36  ;;  %v282_v20 = vadd.f32 %v281_v14, %v1860_v38  ;;  %v492_v34 = vmax.f32 %v460_v16, 0.0  ;;  %956 = vmatmul.mubr.bf16.gmra.mrb[20].mxu1 %v505_v30  ;;  %v355_v59 = vadd.f32 %v354_v15, %v1862_v39 }
  0xfa   :  { %1029 = vmatmul.mubr.bf16.gmra.mrb[20].mxu0 %v507_v17  ;;  %v284_v6 = vadd.f32 %v283_v22, %v1855_v35  ;;  %v357_v60 = vadd.f32 %v356_v23, %v1857_v36  ;;  %v407_v7 = vmul.f32 %v1865_v40, %v280_v42  ;;  %v286_v48 = vadd.f32 %v285_v31, %v1860_v38 }
  0xfb   :  { %v409_v21 = vmul.f32 %v1867_v41, %v353_v27  ;;  %v408_v26 = vmul.f32 %v1870_v44, %v282_v20  ;;  %v410_v50 = vmul.f32 %v1872_v45, %v355_v59  ;;  %v359_v54 = vadd.f32 %v358_v33, %v1862_v39 }
  0xfc   :  { %v411_v51 = vmul.f32 %v1865_v40, %v284_v6  ;;  %v413_v52 = vmul.f32 %v1867_v41, %v357_v60  ;;  %v461_v35 = vadd.f32 %v1876_v47, %v407_v7  ;;  %v412_v43 = vmul.f32 %v1870_v44, %v286_v48 }
  0xfd   :  { %v463_v36 = vadd.f32 %v1879_v49, %v409_v21  ;;  %v462_v56 = vadd.f32 %v1883_v53, %v408_v26  ;;  %v464_v46 = vadd.f32 %v1886_v55, %v410_v50  ;;  %v414_v40 = vmul.f32 %v1872_v45, %v359_v54 }
  0xfe   :  { %v465_v38 = vadd.f32 %v1876_v47, %v411_v51  ;;  %v467_v57 = vadd.f32 %v1879_v49, %v413_v52  ;;  %v493_v58 = vmax.f32 %v461_v35, 0.0  ;;  %v466_v39 = vadd.f32 %v1883_v53, %v412_v43 }
  0xff   :  { %v495_v41 = vmax.f32 %v463_v36, 0.0  ;;  %v494_v61 = vmax.f32 %v462_v56, 0.0  ;;  %v496_v62 = vmax.f32 %v464_v46, 0.0  ;;  %v468_v2 = vadd.f32 %v1886_v55, %v414_v40 }
 0x100   :  { %v497_v63 = vmax.f32 %v465_v38, 0.0  ;;  %v499_v0 = vmax.f32 %v467_v57, 0.0  ;;  %v498_v4 = vmax.f32 %v466_v39, 0.0  ;;  %v510_v44 = vpack.c.bf16 %v490_v37, %v486_v11 }
 0x101   :  { %v512_v5 = vpack.c.bf16 %v492_v34, %v488_v3  ;;  %v509_v8 = vpack.c.bf16 %v489_v24, %v485_v1  ;;  %v500_v12 = vmax.f32 %v468_v2, 0.0  ;;  %v511_v47 = vpack.c.bf16 %v491_v25, %v487_v10 }
 0x102   :  { %v513_v13 = vpack.c.bf16 %v497_v63, %v493_v58  ;;  %v515_v49 = vpack.c.bf16 %v499_v0, %v495_v41  ;;  %965 = vmatprep.mubr.bf16.mxu1 %v510_v44  ;;  %v514_v45 = vpack.c.bf16 %v498_v4, %v494_v61  ;;  %v1521_v55 = vmov 0.0  }
 0x103   :  { %1038 = vmatprep.mubr.bf16.mxu0 %v512_v5  ;;  %966 = vmatmul.mubr.bf16.gmra.mrb[24].mxu1 %v509_v8  ;;  %v516_v14 = vpack.c.bf16 %v500_v12, %v496_v62  ;;  %102 = vst.msk [vmem:[%s2100_s10] sm:$0x3] %vm2012_vm2, %v1521_v55  ;;  %103 = vst.msk [vmem:[%s2101_s11] sm:$0x3] %vm2012_vm2, %v1521_v55  ;;  %v2030_v1 = vrot.slane %v581_v9, %v1844_v29 }
 0x104   :  { %1039 = vmatmul.mubr.bf16.gmra.mrb[24].mxu0 %v511_v47  ;;  %975 = vmatprep.mubr.bf16.mxu1 %v514_v45  ;;  %v2033_v10 = vrot.slane %v581_v9, %v1851_v32 }
 0x105   :  { %1048 = vmatprep.mubr.bf16.mxu0 %v516_v14 }
 0x10b   :  { %976 = vmatmul.mubr.bf16.gmra.mrb[28].mxu1 %v513_v13 }
 0x10c   :  { %1049 = vmatmul.mubr.bf16.gmra.mrb[28].mxu0 %v515_v49 }
 0x1c3   :  { %v947_v11 = vpop.f32.mrb[16].mxu1  ;;  %v1020_v15 = vpop.f32.mrb[16].mxu0 }
 0x1c4   :  { %v948_v3 = vadd.f32 %v947_v11, %v2030_v1  ;;  %v949_v16 = vpop.f32.mrb[17].mxu1  ;;  %v1022_v18 = vpop.f32.mrb[17].mxu0 }
 0x1c5   :  { %v950_v19 = vadd.f32 %v949_v16, %v2033_v10  ;;  %v951_v22 = vpop.f32.mrb[18].mxu1  ;;  %v1024_v23 = vpop.f32.mrb[18].mxu0 }
 0x1c6   :  { %v1021_v24 = vadd.f32 %v1020_v15, %v948_v3  ;;  %v952_v25 = vadd.f32 %v951_v22, %v2030_v1  ;;  %v953_v30 = vpop.f32.mrb[19].mxu1  ;;  %v1026_v17 = vpop.f32.mrb[19].mxu0 }
 0x1c7   :  { %v1023_v29 = vadd.f32 %v1022_v18, %v950_v19  ;;  %v954_v31 = vadd.f32 %v953_v30, %v2033_v10 }
 0x1c8   :  { %v1025_v32 = vadd.f32 %v1024_v23, %v952_v25  ;;  %v1167_v42 = vmul.f32 %v1021_v24, %v1021_v24 }
 0x1c9   :  { %v1363_v33 = vpack.c.bf16 %v1023_v29, %v1021_v24  ;;  %v1027_v37 = vadd.f32 %v1026_v17, %v954_v31  ;;  %v1168_v34 = vmul.f32 %v1023_v29, %v1023_v29 }
 0x1ca   :  { %v1116_v27 = vadd.f32 %v1025_v32, %v1021_v24  ;;  %v1169_v20 = vmul.f32 %v1025_v32, %v1025_v32 }
 0x1cb   :  { %1107 = vst [vmem:[%s2103_s9] sm:$0xff] %v1363_v33  ;;  %v1364_v59 = vpack.c.bf16 %v1027_v37, %v1025_v32  ;;  %v1129_v6 = vadd.f32 %v1027_v37, %v1023_v29  ;;  %v1170_v60 = vmul.f32 %v1027_v37, %v1027_v37 }
 0x1cc   :  { %v1183_v7 = vadd.f32 %v1169_v20, %v1167_v42  ;;  %v957_v21 = vpop.f32.mrb[20].mxu1 }
 0x1cd   :  { %v1030_v26 = vpop.f32.mrb[20].mxu0  ;;  %1108 = vst [vmem:[%s2103_s9 + $0x8] sm:$0xff] %v1364_v59  ;;  %v1196_v48 = vadd.f32 %v1170_v60, %v1168_v34  ;;  %v958_v50 = vadd.f32 %v957_v21, %v2030_v1  ;;  %v959_v51 = vpop.f32.mrb[21].mxu1 }
 0x1ce   :  { %v1032_v52 = vpop.f32.mrb[21].mxu0  ;;  %v960_v54 = vadd.f32 %v959_v51, %v2033_v10  ;;  %v961_v35 = vpop.f32.mrb[22].mxu1 }
 0x1cf   :  { %v1034_v36 = vpop.f32.mrb[22].mxu0  ;;  %v1031_v56 = vadd.f32 %v1030_v26, %v958_v50  ;;  %v962_v43 = vadd.f32 %v961_v35, %v2030_v1  ;;  %v963_v46 = vpop.f32.mrb[23].mxu1 }
 0x1d0   :  { %v1036_v38 = vpop.f32.mrb[23].mxu0  ;;  %v1033_v57 = vadd.f32 %v1032_v52, %v960_v54  ;;  %v964_v40 = vadd.f32 %v963_v46, %v2033_v10 }
 0x1d1   :  { %v1117_v58 = vadd.f32 %v1116_v27, %v1031_v56  ;;  %v1171_v41 = vmul.f32 %v1031_v56, %v1031_v56  ;;  %v1035_v61 = vadd.f32 %v1034_v36, %v962_v43 }
 0x1d2   :  { %v1365_v39 = vpack.c.bf16 %v1033_v57, %v1031_v56  ;;  %v1130_v62 = vadd.f32 %v1129_v6, %v1033_v57  ;;  %v1172_v63 = vmul.f32 %v1033_v57, %v1033_v57  ;;  %v1037_v0 = vadd.f32 %v1036_v38, %v964_v40 }
 0x1d3   :  { %v1184_v2 = vadd.f32 %v1183_v7, %v1171_v41  ;;  %v1118_v4 = vadd.f32 %v1117_v58, %v1035_v61  ;;  %v1173_v44 = vmul.f32 %v1035_v61, %v1035_v61 }
 0x1d4   :  { %1109 = vst [vmem:[%s2103_s9 + $0x10] sm:$0xff] %v1365_v39  ;;  %v1197_v5 = vadd.f32 %v1196_v48, %v1172_v63  ;;  %v1366_v8 = vpack.c.bf16 %v1037_v0, %v1035_v61  ;;  %v1131_v12 = vadd.f32 %v1130_v62, %v1037_v0  ;;  %v1174_v47 = vmul.f32 %v1037_v0, %v1037_v0 }
 0x1d5   :  { %v1185_v13 = vadd.f32 %v1184_v2, %v1173_v44 }
 0x1d6   :  { %1110 = vst [vmem:[%s2103_s9 + $0x18] sm:$0xff] %v1366_v8  ;;  %v1198_v49 = vadd.f32 %v1197_v5, %v1174_v47  ;;  %v967_v45 = vpop.f32.mrb[24].mxu1 }
 0x1d7   :  { %v1040_v14 = vpop.f32.mrb[24].mxu0  ;;  %v968_v55 = vadd.f32 %v967_v45, %v2030_v1  ;;  %v969_v9 = vpop.f32.mrb[25].mxu1 }
 0x1d8   :  { %v1042_v11 = vpop.f32.mrb[25].mxu0  ;;  %v970_v15 = vadd.f32 %v969_v9, %v2033_v10  ;;  %v971_v3 = vpop.f32.mrb[26].mxu1  ;;  %v1522_v9 = vmov 1966171168  }
 0x1d9   :  { %v1044_v16 = vpop.f32.mrb[26].mxu0  ;;  %v1041_v18 = vadd.f32 %v1040_v14, %v968_v55  ;;  %v972_v19 = vadd.f32 %v971_v3, %v2030_v1  ;;  %v973_v22 = vpop.f32.mrb[27].mxu1 }
 0x1da   :  { %v1046_v23 = vpop.f32.mrb[27].mxu0  ;;  %v1043_v24 = vadd.f32 %v1042_v11, %v970_v15  ;;  %v974_v25 = vadd.f32 %v973_v22, %v2033_v10  ;;  %v1146_v11 = vunpack.c.l.s4 %v1522_v9 }
 0x1db   :  { %v1119_v30 = vadd.f32 %v1118_v4, %v1041_v18  ;;  %v1175_v17 = vmul.f32 %v1041_v18, %v1041_v18  ;;  %v1045_v29 = vadd.f32 %v1044_v16, %v972_v19 }
 0x1dc   :  { %v1367_v31 = vpack.c.bf16 %v1043_v24, %v1041_v18  ;;  %v1132_v32 = vadd.f32 %v1131_v12, %v1043_v24  ;;  %v1176_v33 = vmul.f32 %v1043_v24, %v1043_v24  ;;  %v1047_v37 = vadd.f32 %v1046_v23, %v974_v25 }
 0x1dd   :  { %v1186_v42 = vadd.f32 %v1185_v13, %v1175_v17  ;;  %v1120_v27 = vadd.f32 %v1119_v30, %v1045_v29  ;;  %v1177_v20 = vmul.f32 %v1045_v29, %v1045_v29  ;;  %v1147_v25 = vunpack.c.0.s8 %v1146_v11 }
 0x1de   :  { %1111 = vst [vmem:[%s2103_s9 + $0x20] sm:$0xff] %v1367_v31  ;;  %v1199_v34 = vadd.f32 %v1198_v49, %v1176_v33  ;;  %v1368_v59 = vpack.c.bf16 %v1047_v37, %v1045_v29  ;;  %v1133_v6 = vadd.f32 %v1132_v32, %v1047_v37  ;;  %v1178_v60 = vmul.f32 %v1047_v37, %v1047_v37  ;;  %v977_v7 = vpop.f32.mrb[28].mxu1 }
 0x1df   :  { %v1050_v21 = vpop.f32.mrb[28].mxu0  ;;  %v1187_v26 = vadd.f32 %v1186_v42, %v1177_v20  ;;  %v978_v48 = vadd.f32 %v977_v7, %v2030_v1  ;;  %v979_v50 = vpop.f32.mrb[29].mxu1 }
 0x1e0   :  { %v1052_v51 = vpop.f32.mrb[29].mxu0  ;;  %1112 = vst [vmem:[%s2103_s9 + $0x28] sm:$0xff] %v1368_v59  ;;  %v1200_v52 = vadd.f32 %v1199_v34, %v1178_v60  ;;  %v980_v54 = vadd.f32 %v979_v50, %v2033_v10  ;;  %v981_v35 = vpop.f32.mrb[30].mxu1  ;;  %v1166_v50 = vld [vmem:[%s2101_s11] sm:$0x3] }
 0x1e1   :  { %v1054_v36 = vpop.f32.mrb[30].mxu0  ;;  %v1051_v56 = vadd.f32 %v1050_v21, %v978_v48  ;;  %v982_v43 = vadd.f32 %v981_v35, %v2030_v1  ;;  %v983_v46 = vpop.f32.mrb[31].mxu1  ;;  %v1115_v21 = vld [vmem:[%s2100_s10] sm:$0x3] }
 0x1e2   :  { %v1056_v38 = vpop.f32.mrb[31].mxu0  ;;  %v1053_v57 = vadd.f32 %v1052_v51, %v980_v54  ;;  %v984_v40 = vadd.f32 %v983_v46, %v2033_v10 }
 0x1e3   :  { %v1121_v58 = vadd.f32 %v1120_v27, %v1051_v56  ;;  %v1179_v41 = vmul.f32 %v1051_v56, %v1051_v56  ;;  %v1055_v61 = vadd.f32 %v1054_v36, %v982_v43  ;;  %v1150_v27 = vsub.s32 %v1147_v25, %v1841_v28 }
 0x1e4   :  { %v1369_v39 = vpack.c.bf16 %v1053_v57, %v1051_v56  ;;  %v1134_v62 = vadd.f32 %v1133_v6, %v1053_v57  ;;  %v1180_v63 = vmul.f32 %v1053_v57, %v1053_v57  ;;  %v1057_v0 = vadd.f32 %v1056_v38, %v984_v40 }
 0x1e5   :  { %v1188_v2 = vadd.f32 %v1187_v26, %v1179_v41  ;;  %v1122_v4 = vadd.f32 %v1121_v58, %v1055_v61  ;;  %v1181_v44 = vmul.f32 %v1055_v61, %v1055_v61 }
 0x1e6   :  { %1113 = vst [vmem:[%s2103_s9 + $0x30] sm:$0xff] %v1369_v39  ;;  %v1201_v1 = vadd.f32 %v1200_v52, %v1180_v63  ;;  %v1370_v5 = vpack.c.bf16 %v1057_v0, %v1055_v61  ;;  %v1135_v8 = vadd.f32 %v1134_v62, %v1057_v0  ;;  %v1182_v12 = vmul.f32 %v1057_v0, %v1057_v0 }
 0x1e7   :  { %v1123_v47 = vrot.slane %v1122_v4, 4  ;;  %v1189_v10 = vadd.f32 %v1188_v2, %v1181_v44 }
 0x1e8   :  { %1114 = vst [vmem:[%s2103_s9 + $0x38] sm:$0xff] %v1370_v5  ;;  %v1136_v13 = vrot.slane %v1135_v8, 4  ;;  %v1202_v49 = vadd.f32 %v1201_v1, %v1182_v12 }
 0x1e9   :  { %v1124_v45 = vadd.f32 %v1123_v47, %v1122_v4  ;;  %v1190_v14 = vrot.slane %v1189_v10, 4 }
 0x1ea   :  { %v1137_v55 = vadd.f32 %v1136_v13, %v1135_v8  ;;  %v1203_v15 = vrot.slane %v1202_v49, 4 }
 0x1eb   :  { %v1125_v3 = vrot.slane %v1124_v45, 2  ;;  %v1191_v16 = vadd.f32 %v1190_v14, %v1189_v10 }
 0x1ec   :  { %v1138_v18 = vrot.slane %v1137_v55, 2  ;;  %v1204_v19 = vadd.f32 %v1203_v15, %v1202_v49 }
 0x1ed   :  { %v1126_v22 = vadd.f32 %v1125_v3, %v1124_v45  ;;  %v1192_v23 = vrot.slane %v1191_v16, 2 }
 0x1ee   :  { %v1139_v24 = vadd.f32 %v1138_v18, %v1137_v55  ;;  %v1205_v30 = vrot.slane %v1204_v19, 2 }
 0x1ef   :  { %v1127_v17 = vrot.slane %v1126_v22, 1  ;;  %v1193_v29 = vadd.f32 %v1192_v23, %v1191_v16 }
 0x1f0   :  { %v1140_v31 = vrot.slane %v1139_v24, 1  ;;  %v1206_v32 = vadd.f32 %v1205_v30, %v1204_v19 }
 0x1f1   :  { %v1128_v33 = vadd.f32 %v1127_v17, %v1126_v22  ;;  %v1194_v37 = vrot.slane %v1193_v29, 1 }
 0x1f2   :  { %v1141_v42 = vadd.f32 %v1140_v31, %v1139_v24  ;;  %v1207_v20 = vrot.slane %v1206_v32, 1 }
 0x1f3   :  { %v1195_v34 = vadd.f32 %v1194_v37, %v1193_v29 }
 0x1f4   :  { %v1144_v59 = vcombine.low %v1128_v33, %v1141_v42  ;;  %v1208_v6 = vadd.f32 %v1207_v20, %v1206_v32 }
 0x1f6   :  { %v1151_v60 = vrot.slane %v1144_v59, %v1150_v27  ;;  %v1211_v7 = vcombine.low %v1195_v34, %v1208_v6 }
 0x1f8   :  { %v1158_v26 = vrot.slane %v1151_v60, %v1150_v27  ;;  %v1218_v48 = vrot.slane %v1211_v7, %v1150_v27 }
 0x1fa   :  { %v1160_v51 = vadd.f32 %v1158_v26, %v1115_v21  ;;  %v1225_v52 = vrot.slane %v1218_v48, %v1150_v27 }
 0x1fc   :  { %1165 = vst.msk [vmem:[%s2100_s10] sm:$0x3] %vm2012_vm2, %v1160_v51  ;;  %v1227_v28 = vadd.f32 %v1225_v52, %v1166_v50 }
 0x1fe   :  { %1228 = vst.msk [vmem:[%s2101_s11] sm:$0x3] %vm2012_vm2, %v1227_v28 }

</bundles_post_ra>
